<compile_context>
chip_gen: v6e
topology: v6e:2x2x1
jax: 0.10.0
libtpu: 0.0.40
codegen_flags: <defaults>
</compile_context>

<pallas_src>
import functools

import jax
import jax.numpy as jnp
from jax.experimental import pallas as pl
from jax.experimental.pallas import tpu as pltpu


def _round_up(a: int, m: int) -> int:
    return (a + m - 1) // m * m


def _pad2(a, rows: int, cols: int):
    pr, pc = rows - a.shape[0], cols - a.shape[1]
    if pr or pc:
        a = jnp.pad(a, ((0, pr), (0, pc)))
    return a


def autorec_kernel(x_ref, w_enc_ref, b_enc_ref, w_dec_ref, b_dec_ref, o_ref, h_ref):
    """Grid = (batch tile i [parallel], decoder column tile j [arbitrary])."""
    j = pl.program_id(1)

    # Encoder runs once per batch tile (j == 0); result cached in VMEM scratch.
    @pl.when(j == 0)
    def _():
        acc = jnp.dot(x_ref[...], w_enc_ref[...],
                      preferred_element_type=jnp.float32)
        h_ref[...] = jax.nn.sigmoid(acc + b_enc_ref[...])   # f32 epilogue

    # Decoder for this column block: h @ W_dec[:, j_blk] + b_dec[j_blk]
    h = h_ref[...].astype(w_dec_ref.dtype)
    out = jnp.dot(h, w_dec_ref[...], preferred_element_type=jnp.float32)
    o_ref[...] = (out + b_dec_ref[...]).astype(o_ref.dtype)


def autorec_forward(x, w_enc_t, b_enc, w_dec_t, b_dec, *,
                    tile_b: int = 128, tile_n: int = 256,
                    compute_dtype=jnp.bfloat16, out_dtype=None):
    """x: (B, num_items); w_enc_t: (num_items, hidden); w_dec_t: (hidden, num_items)."""
    B, num_items = x.shape
    K, hidden = w_enc_t.shape
    assert K == num_items and w_dec_t.shape == (hidden, num_items)
    out_dtype = out_dtype or x.dtype

    # Batch tile: multiple of 16 (bf16 sublane packing); pad B up to it.
    tile_b = min(tile_b, _round_up(B, 16))
    B_p = _round_up(B, tile_b)

    # Item (lane) dimension: tile_n is a multiple of 128; pad num_items up to it.
    tile_n = min(tile_n, _round_up(num_items, 128))
    N_p = _round_up(num_items, tile_n)

    x_p = _pad2(x.astype(compute_dtype), B_p, N_p)
    w_enc_p = _pad2(w_enc_t.astype(compute_dtype), N_p, hidden)
    w_dec_p = _pad2(w_dec_t.astype(compute_dtype), hidden, N_p)
    b_enc2 = b_enc.astype(jnp.float32).reshape(1, hidden)
    b_dec2 = _pad2(b_dec.astype(jnp.float32).reshape(1, num_items), 1, N_p)

    grid = (B_p // tile_b, N_p // tile_n)

    # VMEM budget: 2x double-buffered blocks + scratch, with headroom, <= 64 MiB
    # so the limit is valid on v7x (64 MiB physical per TC) as well as v5e/v6e.
    isz = jnp.dtype(compute_dtype).itemsize
    osz = jnp.dtype(out_dtype).itemsize
    vmem_est = 2 * (tile_b * N_p * isz          # x tile
                    + N_p * hidden * isz        # W_enc (resident)
                    + hidden * 4                # b_enc
                    + hidden * tile_n * isz     # W_dec column block
                    + tile_n * 4                # b_dec block
                    + tile_b * tile_n * osz)    # out tile
    vmem_est += tile_b * hidden * 4             # h scratch
    vmem_limit = int(min(max(2 * vmem_est, 32 * 1024 * 1024), 64 * 1024 * 1024))

    cost = pl.CostEstimate(
        flops=4 * B_p * N_p * hidden,           # encoder + decoder matmuls
        transcendentals=B_p * hidden,           # sigmoid
        bytes_accessed=(x_p.size * isz + w_enc_p.size * isz + w_dec_p.size * isz
                        + b_enc2.size * 4 + b_dec2.size * 4 + B_p * N_p * osz),
    )

    out = pl.pallas_call(
        autorec_kernel,
        out_shape=jax.ShapeDtypeStruct((B_p, N_p), out_dtype),
        grid_spec=pltpu.PrefetchScalarGridSpec(
            num_scalar_prefetch=0,
            grid=grid,
            in_specs=[
                pl.BlockSpec((tile_b, N_p), lambda i, j: (i, 0)),     # x tile
                pl.BlockSpec((N_p, hidden), lambda i, j: (0, 0)),     # W_enc^T (resident)
                pl.BlockSpec((1, hidden), lambda i, j: (0, 0)),       # b_enc
                pl.BlockSpec((hidden, tile_n), lambda i, j: (0, j)),  # W_dec^T column blk
                pl.BlockSpec((1, tile_n), lambda i, j: (0, j)),       # b_dec block
            ],
            out_specs=pl.BlockSpec((tile_b, tile_n), lambda i, j: (i, j)),
            scratch_shapes=[pltpu.VMEM((tile_b, hidden), jnp.float32)],  # h cache
        ),
        compiler_params=pltpu.CompilerParams(
            dimension_semantics=("parallel", "arbitrary"),
            vmem_limit_bytes=vmem_limit),
        cost_estimate=cost,
    )(x_p, w_enc_p, b_enc2, w_dec_p, b_dec2)

    return out[:B, :num_items]


def autorec_reference(x, w_enc_t, b_enc, w_dec_t, b_dec):
    h = jax.nn.sigmoid(x @ w_enc_t + b_enc)
    return h @ w_dec_t + b_dec


if __name__ == "__main__":
    # Small but TPU-friendly shapes; num_users is unused in forward.
    config = {"num_users": 64, "num_items": 512, "hidden_units": 128, "lambda": 1.0}
    num_items = config["num_items"]
    hidden = config["hidden_units"]
    batch = 256   # -> 2 batch tiles of 128: gives the "parallel" axis >= 2 steps

    key = jax.random.PRNGKey(0)
    kx, k1, k2, k3, k4 = jax.random.split(key, 5)

    # Mimic PyTorch Linear init U(-1/sqrt(fan_in), +1/sqrt(fan_in)); stored
    # directly in (in, out) layout for the kernel.
    bound_enc = 1.0 / jnp.sqrt(num_items)
    bound_dec = 1.0 / jnp.sqrt(hidden)
    w_enc_t = jax.random.uniform(k1, (num_items, hidden), jnp.float32,
                                 -bound_enc, bound_enc)
    b_enc = jax.random.uniform(k2, (hidden,), jnp.float32, -bound_enc, bound_enc)
    w_dec_t = jax.random.uniform(k3, (hidden, num_items), jnp.float32,
                                 -bound_dec, bound_dec)
    b_dec = jax.random.uniform(k4, (num_items,), jnp.float32, -bound_dec, bound_dec)

    x = jax.random.normal(kx, (batch, num_items), jnp.float32)

    ref = autorec_reference(x, w_enc_t, b_enc, w_dec_t, b_dec)

    # --- f32 path: tight correctness check ------------------------------------
    out_f32 = autorec_forward(x, w_enc_t, b_enc, w_dec_t, b_dec,
                              compute_dtype=jnp.float32)
    out_f32 = jax.block_until_ready(out_f32)
    assert out_f32.shape == (batch, num_items)
    assert jnp.allclose(out_f32, ref, atol=1e-4, rtol=1e-4), "f32 mismatch vs reference"

    # --- bf16 path (default, MXU-fast): compare vs bf16-rounded reference ------
    out_bf16 = autorec_forward(x, w_enc_t, b_enc, w_dec_t, b_dec,
                               compute_dtype=jnp.bfloat16)
    out_bf16 = jax.block_until_ready(out_bf16)
    xb = x.astype(jnp.bfloat16).astype(jnp.float32)
    web = w_enc_t.astype(jnp.bfloat16).astype(jnp.float32)
    wdb = w_dec_t.astype(jnp.bfloat16).astype(jnp.float32)
    ref_bf16 = autorec_reference(xb, web, b_enc, wdb, b_dec)
    assert out_bf16.shape == (batch, num_items)
    assert jnp.allclose(out_bf16, ref_bf16, atol=3e-2, rtol=3e-2), \
        "bf16 mismatch vs bf16 reference"

    print("KERNEL_OK")
</pallas_src>

<mosaic_0001>
module attributes {stable_mosaic.version = 11 : i64} {
  func.func @autorec_kernel(%arg0: i32, %arg1: i32, %arg2: memref<128x512xf32, #tpu.memory_space<vmem>>, %arg3: memref<512x128xf32, #tpu.memory_space<vmem>>, %arg4: memref<1x128xf32, #tpu.memory_space<vmem>>, %arg5: memref<128x256xf32, #tpu.memory_space<vmem>>, %arg6: memref<1x256xf32, #tpu.memory_space<vmem>>, %arg7: memref<128x256xf32, #tpu.memory_space<vmem>>, %arg8: memref<128x128xf32, #tpu.memory_space<vmem>>) attributes {dimension_semantics = [#tpu.dimension_semantics<parallel>, #tpu.dimension_semantics<arbitrary>], iteration_bounds = array<i64: 2, 2>, scalar_prefetch = 0 : i64, scratch_operands = 1 : i64, tpu.core_type = #tpu.core_type<tc>, window_params = [{transform_indices = @transform_0, window_bounds = array<i64: 128, 512>}, {pipeline_mode = #tpu.pipeline_mode<synchronous>, transform_indices = @transform_1, window_bounds = array<i64: 512, 128>}, {pipeline_mode = #tpu.pipeline_mode<synchronous>, transform_indices = @transform_2, window_bounds = array<i64: 1, 128>}, {transform_indices = @transform_3, window_bounds = array<i64: 128, 256>}, {transform_indices = @transform_4, window_bounds = array<i64: 1, 256>}, {transform_indices = @transform_5, window_bounds = array<i64: 128, 256>}]} {
    %c0_i32 = arith.constant 0 : i32
    %0 = arith.cmpi eq, %arg1, %c0_i32 : i32
    %1 = arith.extui %0 : i1 to i32
    %c0_i32_0 = arith.constant 0 : i32
    %2 = arith.cmpi ne, %1, %c0_i32_0 : i32
    scf.if %2 {
      %c0_8 = arith.constant 0 : index
      %c0_9 = arith.constant 0 : index
      %10 = vector.load %arg2[%c0_8, %c0_9] : memref<128x512xf32, #tpu.memory_space<vmem>>, vector<128x512xf32>
      %c0_10 = arith.constant 0 : index
      %c0_11 = arith.constant 0 : index
      %11 = vector.load %arg3[%c0_10, %c0_11] : memref<512x128xf32, #tpu.memory_space<vmem>>, vector<512x128xf32>
      %cst_12 = arith.constant dense<0.000000e+00> : vector<128x128xf32>
      %12 = tpu.matmul %10, %11, %cst_12 {dimension_numbers = #tpu.dot_dimension_numbers<[1], [0], [0], [1], [0, 0, 1, 1], [], []>} : vector<128x512xf32>, vector<512x128xf32>, vector<128x128xf32> -> vector<128x128xf32>
      %c0_13 = arith.constant 0 : index
      %c0_14 = arith.constant 0 : index
      %13 = vector.load %arg4[%c0_13, %c0_14] : memref<1x128xf32, #tpu.memory_space<vmem>>, vector<1x128xf32>
      %14 = vector.broadcast %13 : vector<1x128xf32> to vector<128x128xf32>
      %15 = arith.addf %12, %14 : vector<128x128xf32>
      %16 = arith.negf %15 : vector<128x128xf32>
      %17 = math.exp %16 : vector<128x128xf32>
      %cst_15 = arith.constant 1.000000e+00 : f32
      %18 = vector.broadcast %cst_15 : f32 to vector<128x128xf32>
      %19 = arith.addf %18, %17 : vector<128x128xf32>
      %20 = arith.divf %18, %19 : vector<128x128xf32>
      %c0_16 = arith.constant 0 : index
      %c0_17 = arith.constant 0 : index
      %21 = vector.load %arg8[%c0_16, %c0_17] : memref<128x128xf32, #tpu.memory_space<vmem>>, vector<128x128xf32>
      tpu.vector_store %arg8[%c0_16, %c0_17], %20 {strides = array<i32>} : memref<128x128xf32, #tpu.memory_space<vmem>>, vector<128x128xf32>,
    } else {
    }
    %c0 = arith.constant 0 : index
    %c0_1 = arith.constant 0 : index
    %3 = vector.load %arg8[%c0, %c0_1] : memref<128x128xf32, #tpu.memory_space<vmem>>, vector<128x128xf32>
    %c0_2 = arith.constant 0 : index
    %c0_3 = arith.constant 0 : index
    %4 = vector.load %arg5[%c0_2, %c0_3] : memref<128x256xf32, #tpu.memory_space<vmem>>, vector<128x256xf32>
    %cst = arith.constant dense<0.000000e+00> : vector<128x256xf32>
    %5 = tpu.matmul %3, %4, %cst {dimension_numbers = #tpu.dot_dimension_numbers<[1], [0], [0], [1], [0, 0, 1, 1], [], []>} : vector<128x128xf32>, vector<128x256xf32>, vector<128x256xf32> -> vector<128x256xf32>
    %c0_4 = arith.constant 0 : index
    %c0_5 = arith.constant 0 : index
    %6 = vector.load %arg6[%c0_4, %c0_5] : memref<1x256xf32, #tpu.memory_space<vmem>>, vector<1x256xf32>
    %7 = vector.broadcast %6 : vector<1x256xf32> to vector<128x256xf32>
    %8 = arith.addf %5, %7 : vector<128x256xf32>
    %c0_6 = arith.constant 0 : index
    %c0_7 = arith.constant 0 : index
    %9 = vector.load %arg7[%c0_6, %c0_7] : memref<128x256xf32, #tpu.memory_space<vmem>>, vector<128x256xf32>
    tpu.vector_store %arg7[%c0_6, %c0_7], %8 {strides = array<i32>} : memref<128x256xf32, #tpu.memory_space<vmem>>, vector<128x256xf32>,
    return
  }
  func.func @transform_0(%arg0: i32, %arg1: i32) -> (i32, i32) {
    %c0_i32 = arith.constant 0 : i32
    %c0_i32_0 = arith.constant 0 : i32
    return %arg0, %c0_i32 : i32, i32
  }
  func.func @transform_1(%arg0: i32, %arg1: i32) -> (i32, i32) {
    %c0_i32 = arith.constant 0 : i32
    %c0_i32_0 = arith.constant 0 : i32
    %c0_i32_1 = arith.constant 0 : i32
    return %c0_i32, %c0_i32_0 : i32, i32
  }
  func.func @transform_2(%arg0: i32, %arg1: i32) -> (i32, i32) {
    %c0_i32 = arith.constant 0 : i32
    %c0_i32_0 = arith.constant 0 : i32
    %c0_i32_1 = arith.constant 0 : i32
    return %c0_i32, %c0_i32_0 : i32, i32
  }
  func.func @transform_3(%arg0: i32, %arg1: i32) -> (i32, i32) {
    %c0_i32 = arith.constant 0 : i32
    %c0_i32_0 = arith.constant 0 : i32
    return %c0_i32, %arg1 : i32, i32
  }
  func.func @transform_4(%arg0: i32, %arg1: i32) -> (i32, i32) {
    %c0_i32 = arith.constant 0 : i32
    %c0_i32_0 = arith.constant 0 : i32
    return %c0_i32, %arg1 : i32, i32
  }
  func.func @transform_5(%arg0: i32, %arg1: i32) -> (i32, i32) {
    %c0_i32 = arith.constant 0 : i32
    return %arg0, %arg1 : i32, i32
  }
}

</mosaic_0001>

<bundles_post_ra>
// kernel: tpu_custom_call.1
= control target key start
LH: loop header
LB: loop body
LE: loop exit
PB: predicated region body
PF: predicated region fallthrough
CT: control target
= control target key end

     0   :  { %s2534_s0 = inlined_call_operand.hbm [shape: f32[256,512], index: 0, kind: input, shape index: {}]   ;;  %s2535_s1 = inlined_call_operand.hbm [shape: f32[512,128], index: 1, kind: input, shape index: {}]   ;;  %s2536_s2 = inlined_call_operand.vmem [shape: f32[1,128], index: 2, kind: input, shape index: {}]   ;;  %s2537_s3 = inlined_call_operand.hbm [shape: f32[128,512], index: 3, kind: input, shape index: {}]   ;;  %s2538_s4 = inlined_call_operand.vmem [shape: f32[1,512], index: 4, kind: input, shape index: {}]   ;;  %s2539_s5 = inlined_call_operand.hbm [shape: f32[256,512], index: 5, kind: output, shape index: {}]  }
   0x1   :  { %2553 = sst [smem:[#allocation26_spill]] %s2534_s0 }
   0x2   :  { %2554 = sst [smem:[#allocation27_spill]] %s2535_s1 }
   0x3   :  { %2555 = sst [smem:[#allocation28_spill]] %s2536_s2 }
   0x4   :  { %2556 = sst [smem:[#allocation29_spill]] %s2537_s3 }
   0x5   :  { %2557 = sst [smem:[#allocation30_spill]] %s2538_s4 }
   0x6   :  { %2558 = sst [smem:[#allocation31_spill]] %s2539_s5 }
   0x7   :  { %10 = vsyncpa [#allocation4], 0 }
   0x8   :  { %12 = vsyncpa [#allocation4 + $0x1], 0 }
   0x9   :  { %13 = vsyncpa [#allocation7], 0 }
   0xa   :  { %14 = vsyncpa [#allocation5], 0 }
   0xb   :  { %16 = vsyncpa [#allocation5 + $0x1], 0  ;;  %s2005_s18 = smov 0   ;;  %s2007_s19 = smov 0  }
   0xc   :  { %s2009_s20 = smov 0   ;;  %s2011_s21 = smov 0  }
   0xd   :  { %s2013_s22 = smov 0   ;;  %s2015_s23 = smov 0  }
   0xe   :  { %s2017_s24 = smov 0   ;;  %s2019_s25 = smov 0  }
   0xf   :  { %s2021_s26 = smov 0   ;;  %s2023_s27 = smov 0  }
  0x10   :  { %s2025_s28 = smov 0   ;;  %s2027_s29 = smov 0  }
  0x11   :  { %s2029_s30 = smov 0   ;;  %s2031_s6 = smov 0  }
  0x12 LB: > { %2559 = sst [smem:[#allocation14_spill]] %s1915_s20  ;;  %s31_s7 = sadd.s32 1, %s1951_s29  ;;  %s1959_s6 = sphi %s2031_s6, %s22_s6   ;;  %s1955_s30 = sphi %s2029_s30, %s2607_s30   ;;  %s1951_s29 = sphi %s2027_s29, %s2606_s29   ;;  %s1947_s28 = sphi %s2025_s28, %s2605_s28   ;;  %s1943_s27 = sphi %s2023_s27, %s2604_s27   ;;  %s1939_s26 = sphi %s2021_s26, %s2603_s26   ;;  %s1935_s25 = sphi %s2019_s25, %s2613_s25   ;;  %s1931_s24 = sphi %s2017_s24, %s2612_s24   ;;  %s1927_s23 = sphi %s2015_s23, %s2601_s23   ;;  %s1923_s22 = sphi %s2013_s22, %s2611_s22   ;;  %s1919_s21 = sphi %s2011_s21, %s2610_s21   ;;  %s1915_s20 = sphi %s2009_s20, %s2599_s20   ;;  %s1911_s19 = sphi %s2007_s19, %s2609_s19   ;;  %s1907_s18 = sphi %s2005_s18, %s2608_s18  }
  0x13   : > { %2560 = sst [smem:[#allocation15_spill]] %s1927_s23  ;;  %s34_s8 = sadd.s32 1, %s1955_s30 }
  0x14   : > { %2561 = sst [smem:[#allocation16_spill]] %s1939_s26  ;;  %p32_p0 = scmp.ge.s32.totalorder %s31_s7, 2 }
  0x15   : > { %2562 = sst [smem:[#allocation17_spill]] %s1943_s27  ;;  %s41_s9 = sadd.s32 1, %s1939_s26 }
  0x16   : > { %2563 = sst [smem:[#allocation18_spill]] %s1947_s28  ;;  %p48_p1 = scmp.ne.s32.totalorder %s1939_s26, %s1935_s25 }
  0x17   : > { %2564 = sst [smem:[#allocation19_spill]] %s1951_s29  ;;  %p49_p2 = scmp.eq.s32.totalorder %s1959_s6, 0 }
  0x18   : > { %2565 = sst [smem:[#allocation20_spill]] %s1955_s30  ;;  %s2615_s7 = smov (%p32_p0, %s31_s7), 0 }
  0x19   : > { %2566 = sst [smem:[#allocation21_spill]] %s2615_s7  ;;  %s2617_s8 = smov (!%p32_p0, %s34_s8), %s1955_s30 }
  0x1a   : > { %p2086_p3 = por %p49_p2, %p48_p1  ;;  %s2092_s11 = ssub.s32 %s1951_s29, %s2615_s7 }
  0x1b   : > { %p36_p4 = scmp.ge.s32.totalorder %s2617_s8, 2  ;;  %p107_p5 = scmp.eq.s32.totalorder %s2092_s11, 0 }
  0x1c   : > { %s163_s12 = sadd.s32 1, %s1915_s20  ;;  %p1535_p6 = scmp.lt.s32.totalorder %s1959_s6, 4 }
  0x1d   : > { %s2619_s8 = smov (%p36_p4, %s2617_s8), 0  ;;  %s216_s13 = sand.u32 1, %s1959_s6  }
  0x1e   : > { %2568 = sst [smem:[#allocation22_spill]] %s2619_s8  ;;  %s38_s14 = ssub.s32 %s1955_s30, %s2619_s8 }
  0x1f   : > { %p39_p7 = scmp.eq.s32.totalorder %s38_s14, 0  ;;  %s160_s15 = sor.u32 %s2092_s11, %s38_s14 }
  0x20   : > { %p161_p8 = scmp.eq.s32.totalorder %s160_s15, 0  ;;  %s218_s16 = sand.u32 1, %s1939_s26  }
  0x21   : > { %s2105_s17 = scalar_select %p39_p7, %s1939_s26, %s41_s9  }
  0x22   : > { %s2108_s7 = scalar_select %p161_p8, %s1915_s20, %s163_s12  }
  0x23   : > { %2569 = sst [smem:[#allocation23_spill]] %s2105_s17  ;;  %s1275_s5 = sshll.u32 %s218_s16, 9 }
  0x24   : > { %2570 = sst [smem:[#allocation24_spill]] %s2108_s7  ;;  %s1314_s28 = sshll.u32 %s1955_s30, 13 }
  0x25   : > { %s2571_s0 = sld [smem:[#allocation26_spill]]  ;;  %s220_s3 = scalar_lea.vmem [#allocation3], %s1275_s5 }
  0x26   : > { %s228_s1 = sshll.u32 %s220_s3, 4  ;;  %p2118_p9 = pnand %p1535_p6, %p2086_p3  ;;  %s229_s1 = int_to_ptr.vmem [resolvable:$true] %s228_s1 }
  0x27   : > { %s2122_s9 = scalar_lea.sflag [#allocation4], %s216_s13  ;;  %s1738_s12 = scalar_lea.vmem %s229_s1, 8192 }
  0x28   : > { %p1727_p10 = pneg %p2118_p9  ;;  %p1739_p11 = scmp.ne.s32.totalorder %s229_s1, %s1738_s12 }
  0x29   : > { %s1961_s2 = smov [#allocation3]  }
  0x2a   : > { %p1741_p12 = pnand %p1739_p11, %p1727_p10  ;;  %s1743_s4 = sshll.u32 %s1961_s2, 4  ;;  %s1744_s4 = int_to_ptr.vmem [resolvable:$false] %s1743_s4 }
  0x2b   : > { %s227_s27 = scalar_lea.hbm %s2571_s0, %s1314_s28  ;;  %s1745_s3 = scalar_lea.vmem %s1744_s4, 16384 }
  0x2c   : > { %p1742_p13 = pneg %p1741_p12  ;;  %p1746_p0 = scmp.lt.s32.totalorder %s229_s1, %s1744_s4 }
  0x2d   : > { %p1747_p1 = scmp.lt.s32.totalorder %s1745_s3, %s1738_s12 }
  0x2f   : > { %p1748_p3 = por %p1747_p1, %p1746_p0 }
  0x31   : > { %p1749_p4 = pnand %p1748_p3, %p1742_p13 }
  0x33   : > { %1752 = shalt.err (!%p1749_p4)
}
  0x34   : > { %s2547_s5 = smov 512   ;;  %s1963_s28 = smov 32  }
  0x35   : > { %1526 = dma.hbm_to_vmem [thread:$0]  (!%p2118_p9), %s227_s27, 8192, %s229_s1, %s2122_s9, %s2547_s5, %s2547_s5, %s1963_s28  }
  0x36   : > { %s2132_s10 = sadd.s32 4294967295, %s1959_s6   ;;  %s1271_s13 = sadd.s32 4294967294, %s1959_s6  }
  0x37   : > { %p54_p7 = scmp.ne.s32.totalorder %s1935_s25, %s1931_s24  ;;  %p2544_p8 = scmp.eq.s32.totalorder %s2132_s10, 0 }
  0x38   : > { %s109_s14 = sadd.s32 1, %s1927_s23  ;;  %p116_p10 = scmp.ne.s32.totalorder %s1927_s23, %s1923_s22 }
  0x39   : > { %p2143_p11 = por %p2544_p8, %p54_p7  ;;  %p122_p12 = scmp.ne.s32.totalorder %s1923_s22, %s1919_s21 }
  0x3a   : > { %s2152_s1 = scalar_select %p107_p5, %s1927_s23, %s109_s14  }
  0x3b   : > { %p2156_p9 = por %p116_p10, %p49_p2  ;;  %p2162_p13 = por %p122_p12, %p2544_p8 }
  0x3c   : > { %2574 = sst [smem:[#allocation25_spill]] %s2152_s1  ;;  %p173_p0 = scmp.ne.s32.totalorder %s1915_s20, %s1911_s19 }
  0x3d   : > { %s2576_s24 = scalar_select %p2162_p13, 1, 0 }
  0x3e   : > { %p174_p1 = scmp.eq.s32.totalorder %s2132_s10, 3  ;;  %p179_p3 = scmp.ne.s32.totalorder %s1911_s19, %s1907_s18 }
  0x3f   : > { %p180_p5 = scmp.eq.s32.totalorder %s1271_s13, 3  ;;  %p1272_p2 = scmp.ge.s32.totalorder %s1959_s6, 1 }
  0x40   : > { %p2171_p4 = por %p174_p1, %p173_p0  ;;  %p187_p10 = scmp.lt.s32.totalorder %s1959_s6, 5 }
  0x41   : > { %p2176_p7 = por %p180_p5, %p179_p3  ;;  %s1964_s16 = smov [#allocation6]  }
  0x42   : > { %s2577_s21 = scalar_select %p2171_p4, 1, 0 }
  0x43   : > { %s2578_s8 = scalar_select %p2176_p7, 1, 0 }
  0x44   : > { %p2181_p12 = pnand %p1272_p2, %p187_p10  ;;  %s199_s12 = sshll.u32 %s1964_s16, 4  ;;  %s200_s12 = int_to_ptr.vmem [resolvable:$true] %s199_s12 }
  0x45   : > { %p2191_p0 = pnand %p1535_p6, %p2156_p9  ;;  %s240_s4 = sand.u32 1, %s1927_s23  }
  0x46   : > { %p1519_p8 = pneg %p2181_p12  ;;  %p2581_p1 = scmp.eq.s32.totalorder %s2132_s10, 0 }
  0x47   : > { %s1279_s28 = sshll.u32 %s240_s4, 8  ;;  %s1315_s13 = sshll.u32 %s1951_s29, 8 }
  0x48   : > { %p2198_p3 = pnand %p1519_p8, %p2581_p1  ;;  %s1764_s14 = scalar_lea.vmem %s200_s12, 8192 }
  0x49   : > { %p1765_p2 = scmp.ne.s32.totalorder %s200_s12, %s1764_s14  ;;  %p1772_p4 = scmp.lt.s32.totalorder %s200_s12, %s200_s12 }
  0x4a   : > { %p1755_p5 = pneg %p2198_p3  ;;  %p1773_p6 = scmp.lt.s32.totalorder %s1764_s14, %s1764_s14 }
  0x4c   : > { %p1767_p10 = pnand %p1765_p2, %p1755_p5  ;;  %p1774_p9 = por %p1773_p6, %p1772_p4 }
  0x4e   : > { %p1768_p7 = pneg %p1767_p10 }
  0x50   : > { %p1775_p13 = pnand %p1774_p9, %p1768_p7 }
  0x52   : > { %1778 = shalt.err (!%p1775_p13)
}
  0x53   : > { %s1965_s27 = smov 128   ;;  %s1966_s16 = smov 8  }
  0x54   : > { %s2583_s4 = sld [smem:[#allocation27_spill]]  ;;  %s242_s1 = scalar_lea.vmem [#allocation8], %s1279_s28 }
  0x55   : > { %s2584_s17 = sld [smem:[#allocation29_spill]]  ;;  %s249_s23 = sshll.u32 %s242_s1, 4  ;;  %s250_s23 = int_to_ptr.vmem [resolvable:$true] %s249_s23 }
  0x56   : > { %p1781_p8 = pneg %p2191_p0  ;;  %s1792_s14 = scalar_lea.vmem %s250_s23, 4096 }
  0x57   : > { %p1793_p13 = scmp.ne.s32.totalorder %s250_s23, %s1792_s14  ;;  %s1967_s7 = smov [#allocation8]  }
  0x58   : > { %s1797_s20 = sshll.u32 %s1967_s7, 4  ;;  %s1798_s20 = int_to_ptr.vmem [resolvable:$false] %s1797_s20 }
  0x59   : > { %p1795_p4 = pnand %p1793_p13, %p1781_p8  ;;  %s1799_s3 = scalar_lea.vmem %s1798_s20, 8192 }
  0x5a   : > { %1522 = dma.hbm_to_vmem [thread:$0]  (!%p2198_p3), %s2583_s4, 8192, %s200_s12, [#allocation7], %s1965_s27, %s1965_s27, %s1966_s16  }
  0x5b   : > { %s248_s26 = scalar_lea.hbm %s2584_s17, %s1315_s13  ;;  %p1796_p7 = pneg %p1795_p4 }
  0x5c   : > { %p1800_p1 = scmp.lt.s32.totalorder %s250_s23, %s1798_s20  ;;  %p1801_p5 = scmp.lt.s32.totalorder %s1799_s3, %s1792_s14 }
  0x5e   : > { %p1802_p3 = por %p1801_p5, %p1800_p1 }
  0x60   : > { %p1803_p2 = pnand %p1802_p3, %p1796_p7 }
  0x62   : > { %1806 = shalt.err (!%p1803_p2)
}
  0x63   : > { %s1968_s0 = smov 256   ;;  %s1969_s29 = smov 16  }
  0x64   : > { %s2585_s30 = smov 512   ;;  %269 = sbr.rel (%p2181_p12) target bundleno = 730 (0x2da), region = 40 }
  0x65   : > { %1529 = dma.hbm_to_vmem [thread:$0]  (!%p2191_p0), %s248_s26, 4096, %s250_s23, %s2122_s9, %s2585_s30, %s1968_s0, %s1969_s29  }
  0x66   : > { %s271_s7 = sand.u32 (!%p2181_p12), 1, %s2132_s10   ;;  %s273_s17 = sand.u32 (!%p2181_p12), 1, %s1935_s25  }
  0x67   : > { %s1283_s20 = sshll.u32 (!%p2181_p12), %s273_s17, 9  ;;  %s272_s5 = scalar_lea.sflag (!%p2181_p12), [#allocation4], %s271_s7 }
  0x68   : > { %s2223_s1 = scalar_lea.vmem (!%p2181_p12), [#allocation3], %s1283_s20 }
  0x69   : > { %1890 = dma.done.wait (%p2143_p11), %s272_s5, 8192  }
  0x6a   : > { %1892 = vsyncadd (%p2143_p11), %s272_s5, 4294959104  ;;  %p2586_p10 = scmp.eq.s32.totalorder %s2132_s10, 0 }
  0x6c   : > { %1894 = dma.done.wait (%p2586_p10), [#allocation7], 8192   ;;  %p2587_p0 = pmov %p2586_p10 }
  0x6d   : > { %s286_s23 = sand.u32 1, %s1923_s22   ;;  %p2588_p12 = scmp.ne.s32.totalorder %s2576_s24, 0 }
  0x6e   : > { %1896 = vsyncadd (%p2587_p0), [#allocation7], 4294959104  ;;  %s1285_s26 = sshll.u32 %s286_s23, 8 }
  0x6f   : > { %s2234_s9 = scalar_lea.vmem [#allocation8], %s1285_s26 }
  0x70   : > { %1898 = dma.done.wait (%p2588_p12), %s272_s5, 4096  }
  0x71   : > { %1900 = vsyncadd (%p2588_p12), %s272_s5, 4294963200  ;;  %s2589_s15 = sld [smem:[#allocation17_spill]]  ;;  %s321_s11 = sand.u32 1, %s1911_s19  }
  0x72   : > { %s1286_s10 = sshll.u32 %s321_s11, 8  ;;  %s2590_s27 = sld [smem:[#allocation30_spill]] }
  0x73   : > { %s2254_s24 = scalar_lea.vmem [#allocation9], %s1286_s10 }
  0x77   : > { %s2242_s12 = sshll.u32 %s2589_s15, 1  ;;  %p1288_p6 = scmp.ne.s32.totalorder %s2589_s15, 0 }
  0x78   : > { %p327_p11 = scmp.lt.s32.totalorder %s2242_s12, 3  ;;  %s2591_s3 = sld [smem:[#allocation28_spill]] (!%p1288_p6) }
  0x79   : > { %336 = sbr.rel (%p1288_p6) target bundleno = 456 (0x1c8), region = 56 }
  0x7a   : > { %s2248_s2 = scalar_select %p327_p11, %s2242_s12, 3 }
  0x7c   : > { %s329_s16 = scalar_lea.vmem %s2590_s27, %s2248_s2 }
  0x7e   : > { %v432_v0 = vld [vmem:[#allocation6 + $0xf8] sm:$0xff]  ;;  %v431_v4 = vld [vmem:[#allocation6 + $0xf0] sm:$0xff]  ;;  %v430_v8 = vld [vmem:[#allocation6 + $0xe8] sm:$0xff] }
  0x7f   : > { %v464_v1 = vld [vmem:[#allocation6 + $0x1f8] sm:$0xff]  ;;  %1317 = vmatprep.subr.mxu0 %v432_v0  ;;  %v463_v5 = vld [vmem:[#allocation6 + $0x1f0] sm:$0xff]  ;;  %v462_v9 = vld [vmem:[#allocation6 + $0x1e8] sm:$0xff] }
  0x80   : > { %v416_v2 = vld [vmem:[#allocation6 + $0x78] sm:$0xff]  ;;  %1397 = vmatprep.subr.mxu1 %v464_v1  ;;  %v415_v6 = vld [vmem:[#allocation6 + $0x70] sm:$0xff]  ;;  %v414_v10 = vld [vmem:[#allocation6 + $0x68] sm:$0xff] }
  0x81   : > { %v448_v3 = vld [vmem:[#allocation6 + $0x178] sm:$0xff]  ;;  %1318 = vmatpush3.msra.mxu0 %v416_v2  ;;  %v447_v7 = vld [vmem:[#allocation6 + $0x170] sm:$0xff]  ;;  %v446_v11 = vld [vmem:[#allocation6 + $0x168] sm:$0xff] }
  0x82   : > { %1398 = vmatpush3.msra.mxu1 %v448_v3  ;;  %1319 = vmatprep.subr.mxu0 %v431_v4  ;;  %v429_v12 = vld [vmem:[#allocation6 + $0xe0] sm:$0xff]  ;;  %v428_v16 = vld [vmem:[#allocation6 + $0xd8] sm:$0xff]  ;;  %v427_v20 = vld [vmem:[#allocation6 + $0xd0] sm:$0xff] }
  0x83   : > { %1399 = vmatprep.subr.mxu1 %v463_v5  ;;  %1320 = vmatpush3.msra.mxu0 %v415_v6  ;;  %v461_v13 = vld [vmem:[#allocation6 + $0x1e0] sm:$0xff]  ;;  %v460_v17 = vld [vmem:[#allocation6 + $0x1d8] sm:$0xff]  ;;  %v459_v21 = vld [vmem:[#allocation6 + $0x1d0] sm:$0xff] }
  0x84   : > { %1400 = vmatpush3.msra.mxu1 %v447_v7  ;;  %1321 = vmatprep.subr.mxu0 %v430_v8  ;;  %v413_v14 = vld [vmem:[#allocation6 + $0x60] sm:$0xff]  ;;  %v412_v18 = vld [vmem:[#allocation6 + $0x58] sm:$0xff]  ;;  %v411_v22 = vld [vmem:[#allocation6 + $0x50] sm:$0xff] }
  0x85   : > { %1401 = vmatprep.subr.mxu1 %v462_v9  ;;  %v445_v15 = vld [vmem:[#allocation6 + $0x160] sm:$0xff]  ;;  %1322 = vmatpush3.msra.mxu0 %v414_v10  ;;  %v444_v19 = vld [vmem:[#allocation6 + $0x158] sm:$0xff]  ;;  %v443_v23 = vld [vmem:[#allocation6 + $0x150] sm:$0xff] }
  0x86   : > { %1402 = vmatpush3.msra.mxu1 %v446_v11  ;;  %1323 = vmatprep.subr.mxu0 %v429_v12  ;;  %v426_v24 = vld [vmem:[#allocation6 + $0xc8] sm:$0xff]  ;;  %v425_v28 = vld [vmem:[#allocation6 + $0xc0] sm:$0xff]  ;;  %v424_v32 = vld [vmem:[#allocation6 + $0xb8] sm:$0xff] }
  0x87   : > { %1403 = vmatprep.subr.mxu1 %v461_v13  ;;  %1324 = vmatpush3.msra.mxu0 %v413_v14  ;;  %v458_v25 = vld [vmem:[#allocation6 + $0x1c8] sm:$0xff]  ;;  %v457_v29 = vld [vmem:[#allocation6 + $0x1c0] sm:$0xff]  ;;  %v456_v33 = vld [vmem:[#allocation6 + $0x1b8] sm:$0xff] }
  0x88   : > { %1404 = vmatpush3.msra.mxu1 %v445_v15  ;;  %1325 = vmatprep.subr.mxu0 %v428_v16  ;;  %v410_v26 = vld [vmem:[#allocation6 + $0x48] sm:$0xff]  ;;  %v409_v30 = vld [vmem:[#allocation6 + $0x40] sm:$0xff]  ;;  %v408_v34 = vld [vmem:[#allocation6 + $0x38] sm:$0xff] }
  0x89   : > { %1405 = vmatprep.subr.mxu1 %v460_v17  ;;  %1326 = vmatpush3.msra.mxu0 %v412_v18  ;;  %v442_v27 = vld [vmem:[#allocation6 + $0x148] sm:$0xff]  ;;  %v441_v31 = vld [vmem:[#allocation6 + $0x140] sm:$0xff]  ;;  %v440_v35 = vld [vmem:[#allocation6 + $0x138] sm:$0xff] }
  0x8a   : > { %1406 = vmatpush3.msra.mxu1 %v444_v19  ;;  %1327 = vmatprep.subr.mxu0 %v427_v20  ;;  %v423_v36 = vld [vmem:[#allocation6 + $0xb0] sm:$0xff]  ;;  %v422_v40 = vld [vmem:[#allocation6 + $0xa8] sm:$0xff]  ;;  %v421_v44 = vld [vmem:[#allocation6 + $0xa0] sm:$0xff] }
  0x8b   : > { %1407 = vmatprep.subr.mxu1 %v459_v21  ;;  %1328 = vmatpush3.msra.mxu0 %v411_v22  ;;  %v455_v37 = vld [vmem:[#allocation6 + $0x1b0] sm:$0xff]  ;;  %v454_v41 = vld [vmem:[#allocation6 + $0x1a8] sm:$0xff]  ;;  %v453_v45 = vld [vmem:[#allocation6 + $0x1a0] sm:$0xff] }
  0x8c   : > { %1408 = vmatpush3.msra.mxu1 %v443_v23  ;;  %1329 = vmatprep.subr.mxu0 %v426_v24  ;;  %v407_v38 = vld [vmem:[#allocation6 + $0x30] sm:$0xff]  ;;  %v406_v42 = vld [vmem:[#allocation6 + $0x28] sm:$0xff]  ;;  %v405_v46 = vld [vmem:[#allocation6 + $0x20] sm:$0xff] }
  0x8d   : > { %1409 = vmatprep.subr.mxu1 %v458_v25  ;;  %1330 = vmatpush3.msra.mxu0 %v410_v26  ;;  %v439_v39 = vld [vmem:[#allocation6 + $0x130] sm:$0xff]  ;;  %v438_v43 = vld [vmem:[#allocation6 + $0x128] sm:$0xff]  ;;  %v437_v47 = vld [vmem:[#allocation6 + $0x120] sm:$0xff] }
  0x8e   : > { %1410 = vmatpush3.msra.mxu1 %v442_v27  ;;  %1331 = vmatprep.subr.mxu0 %v425_v28  ;;  %v420_v48 = vld [vmem:[#allocation6 + $0x98] sm:$0xff]  ;;  %v419_v52 = vld [vmem:[#allocation6 + $0x90] sm:$0xff]  ;;  %v418_v56 = vld [vmem:[#allocation6 + $0x88] sm:$0xff] }
  0x8f   : > { %1411 = vmatprep.subr.mxu1 %v457_v29  ;;  %1332 = vmatpush3.msra.mxu0 %v409_v30  ;;  %v452_v49 = vld [vmem:[#allocation6 + $0x198] sm:$0xff]  ;;  %v451_v53 = vld [vmem:[#allocation6 + $0x190] sm:$0xff]  ;;  %v450_v57 = vld [vmem:[#allocation6 + $0x188] sm:$0xff] }
  0x90   : > { %1412 = vmatpush3.msra.mxu1 %v441_v31  ;;  %1333 = vmatprep.subr.mxu0 %v424_v32  ;;  %v404_v50 = vld [vmem:[#allocation6 + $0x18] sm:$0xff]  ;;  %v403_v54 = vld [vmem:[#allocation6 + $0x10] sm:$0xff]  ;;  %v402_v58 = vld [vmem:[#allocation6 + $0x8] sm:$0xff] }
  0x91   : > { %1413 = vmatprep.subr.mxu1 %v456_v33  ;;  %1334 = vmatpush3.msra.mxu0 %v408_v34  ;;  %v436_v51 = vld [vmem:[#allocation6 + $0x118] sm:$0xff]  ;;  %v435_v55 = vld [vmem:[#allocation6 + $0x110] sm:$0xff]  ;;  %v434_v59 = vld [vmem:[#allocation6 + $0x108] sm:$0xff] }
  0x92   : > { %1414 = vmatpush3.msra.mxu1 %v440_v35  ;;  %1335 = vmatprep.subr.mxu0 %v423_v36  ;;  %v417_v60 = vld [vmem:[#allocation6 + $0x80] sm:$0xff]  ;;  %v338_v63 = vld [vmem:[%s2223_s1 + $0x8] sm:$0xff]  ;;  %v340_v1 = vld [vmem:[%s2223_s1 + $0x18] sm:$0xff] }
  0x93   : > { %1415 = vmatprep.subr.mxu1 %v455_v37  ;;  %1336 = vmatpush3.msra.mxu0 %v407_v38  ;;  %v449_v61 = vld [vmem:[#allocation6 + $0x180] sm:$0xff]  ;;  %v339_v3 = vld [vmem:[%s2223_s1 + $0x10] sm:$0xff]  ;;  %v342_v4 = vld [vmem:[%s2223_s1 + $0x28] sm:$0xff] }
  0x94   : > { %1416 = vmatpush3.msra.mxu1 %v439_v39  ;;  %1337 = vmatprep.subr.mxu0 %v422_v40  ;;  %v401_v62 = vld [vmem:[#allocation6] sm:$0xff]  ;;  %v344_v5 = vld [vmem:[%s2223_s1 + $0x38] sm:$0xff]  ;;  %v343_v7 = vld [vmem:[%s2223_s1 + $0x30] sm:$0xff] }
  0x95   : > { %1417 = vmatprep.subr.mxu1 %v454_v41  ;;  %1338 = vmatpush3.msra.mxu0 %v406_v42  ;;  %v433_v0 = vld [vmem:[#allocation6 + $0x100] sm:$0xff]  ;;  %v346_v8 = vld [vmem:[%s2223_s1 + $0x48] sm:$0xff]  ;;  %v348_v9 = vld [vmem:[%s2223_s1 + $0x58] sm:$0xff] }
  0x96   : > { %1418 = vmatpush3.msra.mxu1 %v438_v43  ;;  %1339 = vmatprep.subr.mxu0 %v421_v44  ;;  %v337_v2 = vld [vmem:[%s2223_s1] sm:$0xff]  ;;  %v347_v11 = vld [vmem:[%s2223_s1 + $0x50] sm:$0xff]  ;;  %v350_v12 = vld [vmem:[%s2223_s1 + $0x68] sm:$0xff] }
  0x97   : > { %1419 = vmatprep.subr.mxu1 %v453_v45  ;;  %1340 = vmatpush3.msra.mxu0 %v405_v46  ;;  %v341_v6 = vld [vmem:[%s2223_s1 + $0x20] sm:$0xff]  ;;  %v352_v13 = vld [vmem:[%s2223_s1 + $0x78] sm:$0xff]  ;;  %v351_v15 = vld [vmem:[%s2223_s1 + $0x70] sm:$0xff] }
  0x98   : > { %1420 = vmatpush3.msra.mxu1 %v437_v47  ;;  %1341 = vmatprep.subr.mxu0 %v420_v48  ;;  %v345_v10 = vld [vmem:[%s2223_s1 + $0x40] sm:$0xff]  ;;  %v354_v16 = vld [vmem:[%s2223_s1 + $0x88] sm:$0xff]  ;;  %v356_v17 = vld [vmem:[%s2223_s1 + $0x98] sm:$0xff] }
  0x99   : > { %1421 = vmatprep.subr.mxu1 %v452_v49  ;;  %1342 = vmatpush3.msra.mxu0 %v404_v50  ;;  %v349_v14 = vld [vmem:[%s2223_s1 + $0x60] sm:$0xff]  ;;  %v355_v19 = vld [vmem:[%s2223_s1 + $0x90] sm:$0xff]  ;;  %v358_v20 = vld [vmem:[%s2223_s1 + $0xa8] sm:$0xff] }
  0x9a   : > { %1422 = vmatpush3.msra.mxu1 %v436_v51  ;;  %1343 = vmatprep.subr.mxu0 %v419_v52  ;;  %v353_v18 = vld [vmem:[%s2223_s1 + $0x80] sm:$0xff]  ;;  %v360_v21 = vld [vmem:[%s2223_s1 + $0xb8] sm:$0xff]  ;;  %v359_v23 = vld [vmem:[%s2223_s1 + $0xb0] sm:$0xff] }
  0x9b   : > { %1423 = vmatprep.subr.mxu1 %v451_v53  ;;  %1344 = vmatpush3.msra.mxu0 %v403_v54  ;;  %v357_v22 = vld [vmem:[%s2223_s1 + $0xa0] sm:$0xff]  ;;  %v362_v24 = vld [vmem:[%s2223_s1 + $0xc8] sm:$0xff]  ;;  %v364_v25 = vld [vmem:[%s2223_s1 + $0xd8] sm:$0xff] }
  0x9c   : > { %1424 = vmatpush3.msra.mxu1 %v435_v55  ;;  %1345 = vmatprep.subr.mxu0 %v418_v56  ;;  %v361_v26 = vld [vmem:[%s2223_s1 + $0xc0] sm:$0xff]  ;;  %v363_v27 = vld [vmem:[%s2223_s1 + $0xd0] sm:$0xff]  ;;  %v366_v28 = vld [vmem:[%s2223_s1 + $0xe8] sm:$0xff] }
  0x9d   : > { %1425 = vmatprep.subr.mxu1 %v450_v57  ;;  %1346 = vmatpush3.msra.mxu0 %v402_v58  ;;  %v368_v29 = vld [vmem:[%s2223_s1 + $0xf8] sm:$0xff]  ;;  %v365_v30 = vld [vmem:[%s2223_s1 + $0xe0] sm:$0xff]  ;;  %v367_v31 = vld [vmem:[%s2223_s1 + $0xf0] sm:$0xff] }
  0x9e   : > { %1426 = vmatpush3.msra.mxu1 %v434_v59  ;;  %1347 = vmatprep.subr.mxu0 %v417_v60  ;;  %v370_v32 = vld [vmem:[%s2223_s1 + $0x108] sm:$0xff]  ;;  %v372_v33 = vld [vmem:[%s2223_s1 + $0x118] sm:$0xff]  ;;  %v369_v34 = vld [vmem:[%s2223_s1 + $0x100] sm:$0xff] }
  0x9f   : > { %1427 = vmatprep.subr.mxu1 %v449_v61  ;;  %1348 = vmatpush3.msra.mxu0 %v401_v62  ;;  %v371_v35 = vld [vmem:[%s2223_s1 + $0x110] sm:$0xff]  ;;  %v374_v36 = vld [vmem:[%s2223_s1 + $0x128] sm:$0xff]  ;;  %v376_v37 = vld [vmem:[%s2223_s1 + $0x138] sm:$0xff] }
  0xa0   : > { %536 = vmatprep.mubr.f32.mxu0 %v338_v63  ;;  %1428 = vmatpush3.msra.mxu1 %v433_v0  ;;  %v373_v38 = vld [vmem:[%s2223_s1 + $0x120] sm:$0xff]  ;;  %v375_v39 = vld [vmem:[%s2223_s1 + $0x130] sm:$0xff]  ;;  %v378_v40 = vld [vmem:[%s2223_s1 + $0x148] sm:$0xff] }
  0xa1   : > { %681 = vmatprep.mubr.f32.mxu1 %v340_v1  ;;  %537 = vmatmul.mubr.f32.vlgmr.msra.gmra.mxu0 %v337_v2  ;;  %v380_v41 = vld [vmem:[%s2223_s1 + $0x158] sm:$0xff]  ;;  %v377_v42 = vld [vmem:[%s2223_s1 + $0x140] sm:$0xff]  ;;  %v379_v43 = vld [vmem:[%s2223_s1 + $0x150] sm:$0xff] }
  0xa2   : > { %682 = vmatmul.mubr.f32.vlgmr.msra.gmra.mxu1 %v339_v3  ;;  %541 = vmatprep.mubr.f32.mxu0 %v342_v4  ;;  %v382_v44 = vld [vmem:[%s2223_s1 + $0x168] sm:$0xff]  ;;  %v384_v45 = vld [vmem:[%s2223_s1 + $0x178] sm:$0xff]  ;;  %v381_v46 = vld [vmem:[%s2223_s1 + $0x160] sm:$0xff] }
  0xa3   : > { %686 = vmatprep.mubr.f32.mxu1 %v344_v5  ;;  %v383_v47 = vld [vmem:[%s2223_s1 + $0x170] sm:$0xff]  ;;  %v386_v48 = vld [vmem:[%s2223_s1 + $0x188] sm:$0xff]  ;;  %v388_v49 = vld [vmem:[%s2223_s1 + $0x198] sm:$0xff] }
  0xa4   : > { %v385_v50 = vld [vmem:[%s2223_s1 + $0x180] sm:$0xff]  ;;  %v387_v51 = vld [vmem:[%s2223_s1 + $0x190] sm:$0xff]  ;;  %v390_v52 = vld [vmem:[%s2223_s1 + $0x1a8] sm:$0xff] }
  0xa5   : > { %542 = vmatmul.mubr.f32.gmra.mxu0 %v341_v6  ;;  %v392_v53 = vld [vmem:[%s2223_s1 + $0x1b8] sm:$0xff]  ;;  %v389_v54 = vld [vmem:[%s2223_s1 + $0x1a0] sm:$0xff]  ;;  %v391_v55 = vld [vmem:[%s2223_s1 + $0x1b0] sm:$0xff] }
  0xa6   : > { %687 = vmatmul.mubr.f32.gmra.mxu1 %v343_v7  ;;  %546 = vmatprep.mubr.f32.mxu0 %v346_v8  ;;  %v394_v56 = vld [vmem:[%s2223_s1 + $0x1c8] sm:$0xff]  ;;  %v396_v57 = vld [vmem:[%s2223_s1 + $0x1d8] sm:$0xff]  ;;  %v393_v58 = vld [vmem:[%s2223_s1 + $0x1c0] sm:$0xff] }
  0xa7   : > { %691 = vmatprep.mubr.f32.mxu1 %v348_v9  ;;  %v395_v59 = vld [vmem:[%s2223_s1 + $0x1d0] sm:$0xff]  ;;  %v398_v60 = vld [vmem:[%s2223_s1 + $0x1e8] sm:$0xff]  ;;  %v400_v61 = vld [vmem:[%s2223_s1 + $0x1f8] sm:$0xff] }
  0xa8   : > { %v397_v62 = vld [vmem:[%s2223_s1 + $0x1e0] sm:$0xff]  ;;  %v399_v63 = vld [vmem:[%s2223_s1 + $0x1f0] sm:$0xff] }
  0xa9   : > { %547 = vmatmul.mubr.f32.gmra.mxu0 %v345_v10  ;;  %v2324_v2 = vld [vmem:[%s2591_s3] ss:$0 sm:$0xff] }
  0xaa   : > { %692 = vmatmul.mubr.f32.gmra.mxu1 %v347_v11  ;;  %551 = vmatprep.mubr.f32.mxu0 %v350_v12 }
  0xab   : > { %696 = vmatprep.mubr.f32.mxu1 %v352_v13 }
  0xad   : > { %552 = vmatmul.mubr.f32.gmra.mxu0 %v349_v14 }
  0xae   : > { %697 = vmatmul.mubr.f32.gmra.mxu1 %v351_v15  ;;  %556 = vmatprep.mubr.f32.mxu0 %v354_v16 }
  0xaf   : > { %701 = vmatprep.mubr.f32.mxu1 %v356_v17 }
  0xb1   : > { %557 = vmatmul.mubr.f32.gmra.mxu0 %v353_v18 }
  0xb2   : > { %702 = vmatmul.mubr.f32.gmra.mxu1 %v355_v19  ;;  %561 = vmatprep.mubr.f32.mxu0 %v358_v20 }
  0xb3   : > { %706 = vmatprep.mubr.f32.mxu1 %v360_v21 }
  0xb5   : > { %562 = vmatmul.mubr.f32.gmra.mxu0 %v357_v22 }
  0xb6   : > { %707 = vmatmul.mubr.f32.gmra.mxu1 %v359_v23  ;;  %566 = vmatprep.mubr.f32.mxu0 %v362_v24 }
  0xb7   : > { %711 = vmatprep.mubr.f32.mxu1 %v364_v25 }
  0xb9   : > { %567 = vmatmul.mubr.f32.gmra.mxu0 %v361_v26 }
  0xba   : > { %712 = vmatmul.mubr.f32.gmra.mxu1 %v363_v27  ;;  %571 = vmatprep.mubr.f32.mxu0 %v366_v28 }
  0xbb   : > { %716 = vmatprep.mubr.f32.mxu1 %v368_v29 }
  0xbd   : > { %572 = vmatmul.mubr.f32.gmra.mxu0 %v365_v30 }
  0xbe   : > { %717 = vmatmul.mubr.f32.gmra.mxu1 %v367_v31  ;;  %576 = vmatprep.mubr.f32.mxu0 %v370_v32 }
  0xbf   : > { %721 = vmatprep.mubr.f32.mxu1 %v372_v33 }
  0xc1   : > { %577 = vmatmul.mubr.f32.gmra.mxu0 %v369_v34 }
  0xc2   : > { %722 = vmatmul.mubr.f32.gmra.mxu1 %v371_v35  ;;  %581 = vmatprep.mubr.f32.mxu0 %v374_v36 }
  0xc3   : > { %726 = vmatprep.mubr.f32.mxu1 %v376_v37 }
  0xc5   : > { %582 = vmatmul.mubr.f32.gmra.mxu0 %v373_v38 }
  0xc6   : > { %727 = vmatmul.mubr.f32.gmra.mxu1 %v375_v39  ;;  %586 = vmatprep.mubr.f32.mxu0 %v378_v40 }
  0xc7   : > { %731 = vmatprep.mubr.f32.mxu1 %v380_v41 }
  0xc9   : > { %587 = vmatmul.mubr.f32.gmra.mxu0 %v377_v42 }
  0xca   : > { %732 = vmatmul.mubr.f32.gmra.mxu1 %v379_v43  ;;  %591 = vmatprep.mubr.f32.mxu0 %v382_v44 }
  0xcb   : > { %736 = vmatprep.mubr.f32.mxu1 %v384_v45 }
  0xcd   : > { %592 = vmatmul.mubr.f32.gmra.mxu0 %v381_v46 }
  0xce   : > { %737 = vmatmul.mubr.f32.gmra.mxu1 %v383_v47  ;;  %596 = vmatprep.mubr.f32.mxu0 %v386_v48 }
  0xcf   : > { %741 = vmatprep.mubr.f32.mxu1 %v388_v49 }
  0xd1   : > { %597 = vmatmul.mubr.f32.gmra.mxu0 %v385_v50 }
  0xd2   : > { %742 = vmatmul.mubr.f32.gmra.mxu1 %v387_v51  ;;  %601 = vmatprep.mubr.f32.mxu0 %v390_v52 }
  0xd3   : > { %746 = vmatprep.mubr.f32.mxu1 %v392_v53 }
  0xd5   : > { %602 = vmatmul.mubr.f32.gmra.mxu0 %v389_v54 }
  0xd6   : > { %747 = vmatmul.mubr.f32.gmra.mxu1 %v391_v55  ;;  %606 = vmatprep.mubr.f32.mxu0 %v394_v56 }
  0xd7   : > { %751 = vmatprep.mubr.f32.mxu1 %v396_v57 }
  0xd9   : > { %607 = vmatmul.mubr.f32.gmra.mxu0 %v393_v58 }
  0xda   : > { %752 = vmatmul.mubr.f32.gmra.mxu1 %v395_v59  ;;  %611 = vmatprep.mubr.f32.mxu0 %v398_v60 }
  0xdb   : > { %756 = vmatprep.mubr.f32.mxu1 %v400_v61 }
  0xdd   : > { %612 = vmatmul.mubr.f32.gmra.mxu0 %v397_v62 }
  0xde   : > { %757 = vmatmul.mubr.f32.gmra.mxu1 %v399_v63 }
 0x161   : > { %v1349_v0 = vpop.f32.mrf.mxu0 }
 0x162   : > { %v1429_v1 = vpop.f32.mrf.mxu1 }
 0x163   : > { %v1350_v3 = vpop.f32.mrf.mxu0 }
 0x164   : > { %v1430_v4 = vpop.f32.mrf.mxu1  ;;  %v1351_v5 = vadd.f32 %v1350_v3, %v1349_v0 }
 0x165   : > { %v1352_v6 = vpop.f32.mrf.mxu0  ;;  %v1431_v9 = vadd.f32 %v1430_v4, %v1429_v1 }
 0x166   : > { %v1432_v7 = vpop.f32.mrf.mxu1  ;;  %v539_v8 = vadd.f32 %v1351_v5, %v2324_v2 }
 0x167   : > { %v1353_v10 = vpop.f32.mrf.mxu0 }
 0x168   : > { %v1433_v11 = vpop.f32.mrf.mxu1  ;;  %v684_v12 = vadd.f32 %v1431_v9, %v539_v8  ;;  %v1354_v13 = vadd.f32 %v1353_v10, %v1352_v6 }
 0x169   : > { %v1355_v14 = vpop.f32.mrf.mxu0  ;;  %v1434_v18 = vadd.f32 %v1433_v11, %v1432_v7 }
 0x16a   : > { %v1435_v15 = vpop.f32.mrf.mxu1  ;;  %v1290_v16 = vmul.f32 -1.442695, %v684_v12  ;;  %v544_v17 = vadd.f32 %v1354_v13, %v2324_v2 }
 0x16b   : > { %v1356_v19 = vpop.f32.mrf.mxu0 }
 0x16c   : > { %v1436_v20 = vpop.f32.mrf.mxu1  ;;  %1661 = vpow2.f32 %v1290_v16  ;;  %v689_v21 = vadd.f32 %v1434_v18, %v544_v17  ;;  %v1357_v22 = vadd.f32 %v1356_v19, %v1355_v14 }
 0x16d   : > { %v1358_v23 = vpop.f32.mrf.mxu0  ;;  %v1437_v27 = vadd.f32 %v1436_v20, %v1435_v15 }
 0x16e   : > { %v1438_v24 = vpop.f32.mrf.mxu1  ;;  %v1291_v25 = vmul.f32 -1.442695, %v689_v21  ;;  %v549_v26 = vadd.f32 %v1357_v22, %v2324_v2 }
 0x16f   : > { %v1359_v28 = vpop.f32.mrf.mxu0 }
 0x170   : > { %v1439_v29 = vpop.f32.mrf.mxu1  ;;  %1663 = vpow2.f32 %v1291_v25  ;;  %v694_v30 = vadd.f32 %v1437_v27, %v549_v26  ;;  %v1360_v31 = vadd.f32 %v1359_v28, %v1358_v23 }
 0x171   : > { %v1361_v32 = vpop.f32.mrf.mxu0  ;;  %v1440_v36 = vadd.f32 %v1439_v29, %v1438_v24 }
 0x172   : > { %v1441_v33 = vpop.f32.mrf.mxu1  ;;  %v1292_v34 = vmul.f32 -1.442695, %v694_v30  ;;  %v554_v35 = vadd.f32 %v1360_v31, %v2324_v2 }
 0x173   : > { %v1362_v37 = vpop.f32.mrf.mxu0 }
 0x174   : > { %v1442_v38 = vpop.f32.mrf.mxu1  ;;  %1665 = vpow2.f32 %v1292_v34  ;;  %v699_v39 = vadd.f32 %v1440_v36, %v554_v35  ;;  %v1363_v40 = vadd.f32 %v1362_v37, %v1361_v32 }
 0x175   : > { %v1364_v41 = vpop.f32.mrf.mxu0  ;;  %v1443_v45 = vadd.f32 %v1442_v38, %v1441_v33 }
 0x176   : > { %v1444_v42 = vpop.f32.mrf.mxu1  ;;  %v1293_v43 = vmul.f32 -1.442695, %v699_v39  ;;  %v559_v44 = vadd.f32 %v1363_v40, %v2324_v2 }
 0x177   : > { %v1365_v46 = vpop.f32.mrf.mxu0 }
 0x178   : > { %v1445_v47 = vpop.f32.mrf.mxu1  ;;  %1667 = vpow2.f32 %v1293_v43  ;;  %v704_v48 = vadd.f32 %v1443_v45, %v559_v44  ;;  %v1366_v49 = vadd.f32 %v1365_v46, %v1364_v41 }
 0x179   : > { %v1662_v50 = vpop.eup %1661  ;;  %v1367_v51 = vpop.f32.mrf.mxu0  ;;  %v1446_v56 = vadd.f32 %v1445_v47, %v1444_v42 }
 0x17a   : > { %v1447_v52 = vpop.f32.mrf.mxu1  ;;  %v810_v53 = vadd.f32 1.0, %v1662_v50  ;;  %v1294_v54 = vmul.f32 -1.442695, %v704_v48  ;;  %v564_v55 = vadd.f32 %v1366_v49, %v2324_v2 }
 0x17b   : > { %v1368_v57 = vpop.f32.mrf.mxu0 }
 0x17c   : > { %v1448_v58 = vpop.f32.mrf.mxu1  ;;  %1669 = vrcp.f32 %v810_v53  ;;  %v709_v59 = vadd.f32 %v1446_v56, %v564_v55  ;;  %v1369_v60 = vadd.f32 %v1368_v57, %v1367_v51 }
 0x17d   : > { %v1664_v61 = vpop.eup %1663  ;;  %1671 = vpow2.f32 %v1294_v54  ;;  %v1370_v62 = vpop.f32.mrf.mxu0  ;;  %v1449_v4 = vadd.f32 %v1448_v58, %v1447_v52 }
 0x17e   : > { %v1450_v63 = vpop.f32.mrf.mxu1  ;;  %v811_v0 = vadd.f32 1.0, %v1664_v61  ;;  %v1295_v1 = vmul.f32 -1.442695, %v709_v59  ;;  %v569_v3 = vadd.f32 %v1369_v60, %v2324_v2 }
 0x17f   : > { %v1371_v5 = vpop.f32.mrf.mxu0 }
 0x180   : > { %v1451_v6 = vpop.f32.mrf.mxu1  ;;  %1673 = vrcp.f32 %v811_v0  ;;  %v714_v7 = vadd.f32 %v1449_v4, %v569_v3  ;;  %v1372_v8 = vadd.f32 %v1371_v5, %v1370_v62 }
 0x181   : > { %v1666_v9 = vpop.eup %1665  ;;  %1675 = vpow2.f32 %v1295_v1  ;;  %v1373_v10 = vpop.f32.mrf.mxu0  ;;  %v1452_v15 = vadd.f32 %v1451_v6, %v1450_v63 }
 0x182   : > { %v1453_v11 = vpop.f32.mrf.mxu1  ;;  %v812_v12 = vadd.f32 1.0, %v1666_v9  ;;  %v1296_v13 = vmul.f32 -1.442695, %v714_v7  ;;  %v574_v14 = vadd.f32 %v1372_v8, %v2324_v2 }
 0x183   : > { %v1374_v16 = vpop.f32.mrf.mxu0 }
 0x184   : > { %v1454_v17 = vpop.f32.mrf.mxu1  ;;  %1677 = vrcp.f32 %v812_v12  ;;  %v719_v18 = vadd.f32 %v1452_v15, %v574_v14  ;;  %v1375_v19 = vadd.f32 %v1374_v16, %v1373_v10 }
 0x185   : > { %v1668_v20 = vpop.eup %1667  ;;  %1679 = vpow2.f32 %v1296_v13  ;;  %v1376_v21 = vpop.f32.mrf.mxu0  ;;  %v1455_v26 = vadd.f32 %v1454_v17, %v1453_v11 }
 0x186   : > { %v1456_v22 = vpop.f32.mrf.mxu1  ;;  %v813_v23 = vadd.f32 1.0, %v1668_v20  ;;  %v1297_v24 = vmul.f32 -1.442695, %v719_v18  ;;  %v579_v25 = vadd.f32 %v1375_v19, %v2324_v2 }
 0x187   : > { %v1377_v27 = vpop.f32.mrf.mxu0 }
 0x188   : > { %v1457_v28 = vpop.f32.mrf.mxu1  ;;  %1681 = vrcp.f32 %v813_v23  ;;  %v724_v29 = vadd.f32 %v1455_v26, %v579_v25  ;;  %v1378_v30 = vadd.f32 %v1377_v27, %v1376_v21 }
 0x189   : > { %v1670_v31 = vpop.eup %1669  ;;  %1683 = vpow2.f32 %v1297_v24  ;;  %v1379_v32 = vpop.f32.mrf.mxu0  ;;  %v1458_v37 = vadd.f32 %v1457_v28, %v1456_v22 }
 0x18a   : > { %v1459_v33 = vpop.f32.mrf.mxu1  ;;  %v1672_v34 = vpop.eup %1671  ;;  %858 = vst [vmem:[#allocation2 + $0x30] sm:$0xff] %v1670_v31  ;;  %v1298_v35 = vmul.f32 -1.442695, %v724_v29  ;;  %v584_v36 = vadd.f32 %v1378_v30, %v2324_v2 }
 0x18b   : > { %v814_v38 = vadd.f32 1.0, %v1672_v34  ;;  %v1380_v39 = vpop.f32.mrf.mxu0 }
 0x18c   : > { %v1460_v40 = vpop.f32.mrf.mxu1  ;;  %1685 = vpow2.f32 %v1298_v35  ;;  %v729_v41 = vadd.f32 %v1458_v37, %v584_v36  ;;  %v1381_v42 = vadd.f32 %v1380_v39, %v1379_v32 }
 0x18d   : > { %v1674_v43 = vpop.eup %1673  ;;  %1687 = vrcp.f32 %v814_v38  ;;  %v1382_v44 = vpop.f32.mrf.mxu0  ;;  %v1461_v49 = vadd.f32 %v1460_v40, %v1459_v33 }
 0x18e   : > { %v1462_v45 = vpop.f32.mrf.mxu1  ;;  %v1676_v46 = vpop.eup %1675  ;;  %859 = vst [vmem:[#allocation2] sm:$0xff] %v1674_v43  ;;  %v1299_v47 = vmul.f32 -1.442695, %v729_v41  ;;  %v589_v48 = vadd.f32 %v1381_v42, %v2324_v2 }
 0x18f   : > { %v815_v50 = vadd.f32 1.0, %v1676_v46  ;;  %v1383_v51 = vpop.f32.mrf.mxu0 }
 0x190   : > { %v1463_v52 = vpop.f32.mrf.mxu1  ;;  %1689 = vpow2.f32 %v1299_v47  ;;  %v734_v53 = vadd.f32 %v1461_v49, %v589_v48  ;;  %v1384_v54 = vadd.f32 %v1383_v51, %v1382_v44 }
 0x191   : > { %v1678_v55 = vpop.eup %1677  ;;  %1691 = vrcp.f32 %v815_v50  ;;  %v1385_v56 = vpop.f32.mrf.mxu0  ;;  %v1464_v61 = vadd.f32 %v1463_v52, %v1462_v45 }
 0x192   : > { %v1465_v57 = vpop.f32.mrf.mxu1  ;;  %v1680_v58 = vpop.eup %1679  ;;  %860 = vst [vmem:[#allocation2 + $0x58] sm:$0xff] %v1678_v55  ;;  %v1300_v59 = vmul.f32 -1.442695, %v734_v53  ;;  %v594_v60 = vadd.f32 %v1384_v54, %v2324_v2 }
 0x193   : > { %v816_v62 = vadd.f32 1.0, %v1680_v58  ;;  %v1386_v63 = vpop.f32.mrf.mxu0 }
 0x194   : > { %v1466_v0 = vpop.f32.mrf.mxu1  ;;  %1693 = vpow2.f32 %v1300_v59  ;;  %v739_v1 = vadd.f32 %v1464_v61, %v594_v60  ;;  %v1387_v3 = vadd.f32 %v1386_v63, %v1385_v56 }
 0x195   : > { %v1682_v4 = vpop.eup %1681  ;;  %1695 = vrcp.f32 %v816_v62  ;;  %v1388_v5 = vpop.f32.mrf.mxu0  ;;  %v1467_v10 = vadd.f32 %v1466_v0, %v1465_v57 }
 0x196   : > { %v1468_v6 = vpop.f32.mrf.mxu1  ;;  %v1684_v7 = vpop.eup %1683  ;;  %861 = vst [vmem:[#allocation2 + $0x18] sm:$0xff] %v1682_v4  ;;  %v1301_v8 = vmul.f32 -1.442695, %v739_v1  ;;  %v599_v9 = vadd.f32 %v1387_v3, %v2324_v2 }
 0x197   : > { %v817_v11 = vadd.f32 1.0, %v1684_v7  ;;  %v1389_v12 = vpop.f32.mrf.mxu0 }
 0x198   : > { %v1469_v13 = vpop.f32.mrf.mxu1  ;;  %1697 = vpow2.f32 %v1301_v8  ;;  %v744_v14 = vadd.f32 %v1467_v10, %v599_v9  ;;  %v1390_v15 = vadd.f32 %v1389_v12, %v1388_v5 }
 0x199   : > { %v1686_v16 = vpop.eup %1685  ;;  %1699 = vrcp.f32 %v817_v11  ;;  %v1391_v17 = vpop.f32.mrf.mxu0  ;;  %v1470_v23 = vadd.f32 %v1469_v13, %v1468_v6 }
 0x19a   : > { %v1471_v18 = vpop.f32.mrf.mxu1  ;;  %v1688_v19 = vpop.eup %1687  ;;  %v818_v20 = vadd.f32 1.0, %v1686_v16  ;;  %v1302_v21 = vmul.f32 -1.442695, %v744_v14  ;;  %v604_v22 = vadd.f32 %v1390_v15, %v2324_v2 }
 0x19b   : > { %862 = vst [vmem:[#allocation2 + $0x50] sm:$0xff] %v1688_v19  ;;  %v1392_v24 = vpop.f32.mrf.mxu0 }
 0x19c   : > { %v1472_v25 = vpop.f32.mrf.mxu1  ;;  %1701 = vrcp.f32 %v818_v20  ;;  %v749_v26 = vadd.f32 %v1470_v23, %v604_v22  ;;  %v1393_v27 = vadd.f32 %v1392_v24, %v1391_v17 }
 0x19d   : > { %v1690_v28 = vpop.eup %1689  ;;  %1703 = vpow2.f32 %v1302_v21  ;;  %v1394_v29 = vpop.f32.mrf.mxu0  ;;  %v1473_v35 = vadd.f32 %v1472_v25, %v1471_v18 }
 0x19e   : > { %v1474_v30 = vpop.f32.mrf.mxu1  ;;  %v1692_v31 = vpop.eup %1691  ;;  %v819_v32 = vadd.f32 1.0, %v1690_v28  ;;  %v1303_v33 = vmul.f32 -1.442695, %v749_v26  ;;  %v609_v34 = vadd.f32 %v1393_v27, %v2324_v2 }
 0x19f   : > { %863 = vst [vmem:[#allocation2 + $0x68] sm:$0xff] %v1692_v31  ;;  %v1395_v36 = vpop.f32.mrf.mxu0 }
 0x1a0   : > { %v1475_v37 = vpop.f32.mrf.mxu1  ;;  %1705 = vrcp.f32 %v819_v32  ;;  %v754_v38 = vadd.f32 %v1473_v35, %v609_v34  ;;  %v1396_v39 = vadd.f32 %v1395_v36, %v1394_v29 }
 0x1a1   : > { %v1694_v40 = vpop.eup %1693  ;;  %1707 = vpow2.f32 %v1303_v33  ;;  %v1476_v45 = vadd.f32 %v1475_v37, %v1474_v30 }
 0x1a2   : > { %v1696_v41 = vpop.eup %1695  ;;  %v820_v42 = vadd.f32 1.0, %v1694_v40  ;;  %v1304_v43 = vmul.f32 -1.442695, %v754_v38  ;;  %v614_v44 = vadd.f32 %v1396_v39, %v2324_v2 }
 0x1a3   : > { %864 = vst [vmem:[#allocation2 + $0x8] sm:$0xff] %v1696_v41 }
 0x1a4   : > { %1709 = vrcp.f32 %v820_v42  ;;  %v759_v46 = vadd.f32 %v1476_v45, %v614_v44 }
 0x1a5   : > { %v1698_v47 = vpop.eup %1697  ;;  %1711 = vpow2.f32 %v1304_v43 }
 0x1a6   : > { %v1700_v48 = vpop.eup %1699  ;;  %v821_v49 = vadd.f32 1.0, %v1698_v47  ;;  %v1305_v50 = vmul.f32 -1.442695, %v759_v46 }
 0x1a7   : > { %865 = vst [vmem:[#allocation2 + $0x48] sm:$0xff] %v1700_v48 }
 0x1a8   : > { %1713 = vrcp.f32 %v821_v49 }
 0x1a9   : > { %v1702_v51 = vpop.eup %1701  ;;  %1715 = vpow2.f32 %v1305_v50 }
 0x1aa   : > { %v1704_v52 = vpop.eup %1703  ;;  %866 = vst [vmem:[#allocation2 + $0x40] sm:$0xff] %v1702_v51 }
 0x1ab   : > { %v822_v53 = vadd.f32 1.0, %v1704_v52 }
 0x1ad   : > { %v1706_v54 = vpop.eup %1705  ;;  %1717 = vrcp.f32 %v822_v53 }
 0x1ae   : > { %v1708_v55 = vpop.eup %1707  ;;  %867 = vst [vmem:[#allocation2 + $0x20] sm:$0xff] %v1706_v54 }
 0x1af   : > { %v823_v2 = vadd.f32 1.0, %v1708_v55 }
 0x1b1   : > { %v1710_v56 = vpop.eup %1709  ;;  %1719 = vrcp.f32 %v823_v2 }
 0x1b2   : > { %v1712_v57 = vpop.eup %1711  ;;  %868 = vst [vmem:[#allocation2 + $0x10] sm:$0xff] %v1710_v56 }
 0x1b3   : > { %v824_v58 = vadd.f32 1.0, %v1712_v57 }
 0x1b5   : > { %v1714_v59 = vpop.eup %1713  ;;  %1721 = vrcp.f32 %v824_v58 }
 0x1b6   : > { %v1716_v60 = vpop.eup %1715  ;;  %869 = vst [vmem:[#allocation2 + $0x38] sm:$0xff] %v1714_v59 }
 0x1b7   : > { %v825_v61 = vadd.f32 1.0, %v1716_v60 }
 0x1b9   : > { %1723 = vrcp.f32 %v825_v61 }
 0x1ba   : > { %v1718_v62 = vpop.eup %1717 }
 0x1bb   : > { %870 = vst [vmem:[#allocation2 + $0x60] sm:$0xff] %v1718_v62 }
 0x1be   : > { %v1720_v63 = vpop.eup %1719 }
 0x1bf   : > { %871 = vst [vmem:[#allocation2 + $0x70] sm:$0xff] %v1720_v63 }
 0x1c2   : > { %v1722_v0 = vpop.eup %1721 }
 0x1c3   : > { %872 = vst [vmem:[#allocation2 + $0x78] sm:$0xff] %v1722_v0 }
 0x1c6   : > { %v1724_v1 = vpop.eup %1723 }
 0x1c7   : > { %873 = vst [vmem:[#allocation2 + $0x28] sm:$0xff] %v1724_v1 }
 0x1c8 PF: > { %v921_v3 = vld [vmem:[%s2234_s9 + $0xf8] sm:$0xff]  ;;  %v920_v4 = vld [vmem:[%s2234_s9 + $0xf0] sm:$0xff]  ;;  %v919_v5 = vld [vmem:[%s2234_s9 + $0xe8] sm:$0xff]  ;;  %v1970_v37 = vmov 0.0   ;;  %v924_v52 = vlaneseq  ;;  %s2593_s7 = sld [smem:[#allocation18_spill]]  ;;  %s1144_s1 = sshll.u32 %s2254_s24, 4  ;;  %s2449_s1 = int_to_ptr.vmem [resolvable:$true] %s1144_s1 }
 0x1c9   : > { %934 = vmatprep.subr.mxu0 %v921_v3  ;;  %1477 = vmatprep.subr.mxu1 %v921_v3  ;;  %v918_v6 = vld [vmem:[%s2234_s9 + $0xe0] sm:$0xff]  ;;  %v917_v7 = vld [vmem:[%s2234_s9 + $0xd8] sm:$0xff]  ;;  %v916_v8 = vld [vmem:[%s2234_s9 + $0xd0] sm:$0xff]  ;;  %s1807_s10 = scalar_lea.vmem %s2449_s1, 4096  ;;  %p2595_p8 = scmp.ne.s32.totalorder %s2577_s21, 0 }
 0x1ca   : > { %935 = vmatpush1.msra.mxu0 %v920_v4  ;;  %1493 = vmatpush1.msra.mxu1 %v920_v4  ;;  %v915_v9 = vld [vmem:[%s2234_s9 + $0xc8] sm:$0xff]  ;;  %v914_v10 = vld [vmem:[%s2234_s9 + $0xc0] sm:$0xff]  ;;  %v913_v11 = vld [vmem:[%s2234_s9 + $0xb8] sm:$0xff]  ;;  %v925_v53 = vshrl.u32 %v924_v52, 7  ;;  %p1808_p9 = scmp.ne.s32.totalorder %s2449_s1, %s1807_s10  ;;  %s1971_s2 = smov [#allocation9]  }
 0x1cb   : > { %936 = vmatprep.subr.mxu0 %v919_v5  ;;  %1478 = vmatprep.subr.mxu1 %v919_v5  ;;  %v912_v12 = vld [vmem:[%s2234_s9 + $0xb0] sm:$0xff]  ;;  %v911_v13 = vld [vmem:[%s2234_s9 + $0xa8] sm:$0xff]  ;;  %v910_v14 = vld [vmem:[%s2234_s9 + $0xa0] sm:$0xff]  ;;  %s1811_s28 = sshll.u32 %s1971_s2, 4  ;;  %s1812_s28 = int_to_ptr.vmem [resolvable:$false] %s1811_s28 }
 0x1cc   : > { %937 = vmatpush1.msra.mxu0 %v918_v6  ;;  %1494 = vmatpush1.msra.mxu1 %v918_v6  ;;  %v909_v15 = vld [vmem:[%s2234_s9 + $0x98] sm:$0xff]  ;;  %v908_v16 = vld [vmem:[%s2234_s9 + $0x90] sm:$0xff]  ;;  %v907_v17 = vld [vmem:[%s2234_s9 + $0x88] sm:$0xff]  ;;  %v926_v54 = vsub.s32 0, %v925_v53  ;;  %v930_v2 = vsub.s32 1, %v925_v53  ;;  %p1809_p13 = pnand %p1808_p9, %p2595_p8  ;;  %s1813_s13 = scalar_lea.vmem %s1812_s28, 8192 }
 0x1cd   : > { %938 = vmatprep.subr.mxu0 %v917_v7  ;;  %1479 = vmatprep.subr.mxu1 %v917_v7  ;;  %v906_v18 = vld [vmem:[%s2234_s9 + $0x80] sm:$0xff]  ;;  %v905_v19 = vld [vmem:[%s2234_s9 + $0x78] sm:$0xff]  ;;  %v904_v20 = vld [vmem:[%s2234_s9 + $0x70] sm:$0xff]  ;;  %p1814_p7 = scmp.lt.s32.totalorder %s2449_s1, %s1812_s28  ;;  %p1815_p1 = scmp.lt.s32.totalorder %s1813_s13, %s1807_s10 }
 0x1ce   : > { %939 = vmatpush1.msra.mxu0 %v916_v8  ;;  %1495 = vmatpush1.msra.mxu1 %v916_v8  ;;  %v903_v21 = vld [vmem:[%s2234_s9 + $0x68] sm:$0xff]  ;;  %v902_v22 = vld [vmem:[%s2234_s9 + $0x60] sm:$0xff]  ;;  %v901_v23 = vld [vmem:[%s2234_s9 + $0x58] sm:$0xff]  ;;  %s1316_s17 = sshll.u32 %s2593_s7, 6  ;;  %p1810_p4 = pneg %p1809_p13 }
 0x1cf   : > { %940 = vmatprep.subr.mxu0 %v915_v9  ;;  %1480 = vmatprep.subr.mxu1 %v915_v9  ;;  %v900_v24 = vld [vmem:[%s2234_s9 + $0x50] sm:$0xff]  ;;  %v899_v25 = vld [vmem:[%s2234_s9 + $0x48] sm:$0xff]  ;;  %v898_v26 = vld [vmem:[%s2234_s9 + $0x40] sm:$0xff]  ;;  %s1141_s20 = sadd.s32 %s1316_s17, %s2242_s12  ;;  %s2459_s12 = scalar_lea.sflag [#allocation5], %s321_s11 }
 0x1d0   : > { %941 = vmatpush1.msra.mxu0 %v914_v10  ;;  %1496 = vmatpush1.msra.mxu1 %v914_v10  ;;  %v897_v27 = vld [vmem:[%s2234_s9 + $0x38] sm:$0xff]  ;;  %v896_v28 = vld [vmem:[%s2234_s9 + $0x30] sm:$0xff]  ;;  %v895_v29 = vld [vmem:[%s2234_s9 + $0x28] sm:$0xff]  ;;  %s1310_s5 = sshll.u32 %s1141_s20, 7  ;;  %p1816_p5 = por %p1815_p1, %p1814_p7 }
 0x1d1   : > { %942 = vmatprep.subr.mxu0 %v913_v11  ;;  %1481 = vmatprep.subr.mxu1 %v913_v11  ;;  %v894_v30 = vld [vmem:[%s2234_s9 + $0x20] sm:$0xff]  ;;  %v893_v31 = vld [vmem:[%s2234_s9 + $0x18] sm:$0xff]  ;;  %v892_v32 = vld [vmem:[%s2234_s9 + $0x10] sm:$0xff] }
 0x1d2   : > { %943 = vmatpush1.msra.mxu0 %v912_v12  ;;  %1497 = vmatpush1.msra.mxu1 %v912_v12  ;;  %v891_v33 = vld [vmem:[%s2234_s9 + $0x8] sm:$0xff]  ;;  %v890_v34 = vld [vmem:[%s2234_s9] sm:$0xff]  ;;  %v874_v35 = vld [vmem:[#allocation2 + $0x30] sm:$0xff]  ;;  %s2594_s9 = sld [smem:[#allocation31_spill]]  ;;  %p1817_p3 = pnand %p1816_p5, %p1810_p4 }
 0x1d3   : > { %944 = vmatprep.subr.mxu0 %v911_v13  ;;  %1482 = vmatprep.subr.mxu1 %v911_v13  ;;  %v882_v36 = vld [vmem:[#allocation2 + $0x40] sm:$0xff]  ;;  %v876_v40 = vld [vmem:[#allocation2 + $0x58] sm:$0xff]  ;;  %v884_v41 = vld [vmem:[#allocation2 + $0x10] sm:$0xff] }
 0x1d4   : > { %945 = vmatpush1.msra.mxu0 %v910_v14  ;;  %1498 = vmatpush1.msra.mxu1 %v910_v14  ;;  %v875_v38 = vld [vmem:[#allocation2] sm:$0xff]  ;;  %v877_v42 = vld [vmem:[#allocation2 + $0x18] sm:$0xff]  ;;  %v878_v44 = vld [vmem:[#allocation2 + $0x50] sm:$0xff] }
 0x1d5   : > { %946 = vmatprep.subr.mxu0 %v909_v15  ;;  %1483 = vmatprep.subr.mxu1 %v909_v15  ;;  %v883_v39 = vld [vmem:[#allocation2 + $0x20] sm:$0xff]  ;;  %v885_v43 = vld [vmem:[#allocation2 + $0x38] sm:$0xff]  ;;  %v879_v46 = vld [vmem:[#allocation2 + $0x68] sm:$0xff] }
 0x1d6   : > { %947 = vmatpush1.msra.mxu0 %v908_v16  ;;  %1499 = vmatpush1.msra.mxu1 %v908_v16  ;;  %v886_v45 = vld [vmem:[#allocation2 + $0x60] sm:$0xff]  ;;  %v887_v47 = vld [vmem:[#allocation2 + $0x70] sm:$0xff]  ;;  %v880_v48 = vld [vmem:[#allocation2 + $0x8] sm:$0xff] }
 0x1d7   : > { %948 = vmatprep.subr.mxu0 %v907_v17  ;;  %1484 = vmatprep.subr.mxu1 %v907_v17  ;;  %v888_v49 = vld [vmem:[#allocation2 + $0x78] sm:$0xff]  ;;  %v881_v50 = vld [vmem:[#allocation2 + $0x48] sm:$0xff]  ;;  %v922_v55 = vld [vmem:[%s329_s16] sm:$0x3] }
 0x1d8   : > { %949 = vmatpush1.msra.mxu0 %v906_v18  ;;  %1500 = vmatpush1.msra.mxu1 %v906_v18  ;;  %v889_v51 = vld [vmem:[#allocation2 + $0x28] sm:$0xff]  ;;  %v2379_v56 = vrot.slane %v922_v55, %v926_v54  ;;  %v2381_v57 = vrot.slane %v922_v55, %v930_v2  ;;  %s2447_s15 = scalar_lea.hbm %s2594_s9, %s1310_s5 }
 0x1d9   : > { %950 = vmatprep.subr.mxu0 %v905_v19  ;;  %1485 = vmatprep.subr.mxu1 %v905_v19 }
 0x1da   : > { %951 = vmatpush1.msra.mxu0 %v904_v20  ;;  %1501 = vmatpush1.msra.mxu1 %v904_v20 }
 0x1db   : > { %952 = vmatprep.subr.mxu0 %v903_v21  ;;  %1486 = vmatprep.subr.mxu1 %v903_v21 }
 0x1dc   : > { %953 = vmatpush1.msra.mxu0 %v902_v22  ;;  %1502 = vmatpush1.msra.mxu1 %v902_v22 }
 0x1dd   : > { %954 = vmatprep.subr.mxu0 %v901_v23  ;;  %1487 = vmatprep.subr.mxu1 %v901_v23 }
 0x1de   : > { %955 = vmatpush1.msra.mxu0 %v900_v24  ;;  %1503 = vmatpush1.msra.mxu1 %v900_v24 }
 0x1df   : > { %956 = vmatprep.subr.mxu0 %v899_v25  ;;  %1488 = vmatprep.subr.mxu1 %v899_v25 }
 0x1e0   : > { %957 = vmatpush1.msra.mxu0 %v898_v26  ;;  %1504 = vmatpush1.msra.mxu1 %v898_v26 }
 0x1e1   : > { %958 = vmatprep.subr.mxu0 %v897_v27  ;;  %1489 = vmatprep.subr.mxu1 %v897_v27 }
 0x1e2   : > { %959 = vmatpush1.msra.mxu0 %v896_v28  ;;  %1505 = vmatpush1.msra.mxu1 %v896_v28 }
 0x1e3   : > { %960 = vmatprep.subr.mxu0 %v895_v29  ;;  %1490 = vmatprep.subr.mxu1 %v895_v29 }
 0x1e4   : > { %961 = vmatpush1.msra.mxu0 %v894_v30  ;;  %1506 = vmatpush1.msra.mxu1 %v894_v30 }
 0x1e5   : > { %962 = vmatprep.subr.mxu0 %v893_v31  ;;  %1491 = vmatprep.subr.mxu1 %v893_v31 }
 0x1e6   : > { %963 = vmatpush1.msra.mxu0 %v892_v32  ;;  %1507 = vmatpush1.msra.mxu1 %v892_v32 }
 0x1e7   : > { %964 = vmatprep.subr.mxu0 %v891_v33  ;;  %1492 = vmatprep.subr.mxu1 %v891_v33 }
 0x1e8   : > { %965 = vmatpush1.msra.mxu0 %v890_v34  ;;  %1508 = vmatpush1.msra.mxu1 %v890_v34 }
 0x1e9   : > { %998 = vmatprep.mubr.f32.mxu0 %v1970_v37  ;;  %1046 = vmatprep.mubr.f32.mxu1 %v1970_v37 }
 0x1ea   : > { %999 = vmatmul.mubr.f32.vlgmr.msra.gmra.mxu0 %v874_v35  ;;  %1047 = vmatmul.mubr.f32.vlgmr.msra.gmra.mxu1 %v882_v36 }
 0x1eb   : > { %1004 = vmatprep.mubr.f32.mxu0 %v1970_v37  ;;  %1052 = vmatprep.mubr.f32.mxu1 %v1970_v37 }
 0x1ee   : > { %1005 = vmatmul.mubr.f32.gmra.mxu0 %v875_v38  ;;  %1053 = vmatmul.mubr.f32.gmra.mxu1 %v883_v39 }
 0x1ef   : > { %1010 = vmatprep.mubr.f32.mxu0 %v1970_v37  ;;  %1058 = vmatprep.mubr.f32.mxu1 %v1970_v37 }
 0x1f2   : > { %1011 = vmatmul.mubr.f32.gmra.mxu0 %v876_v40  ;;  %1059 = vmatmul.mubr.f32.gmra.mxu1 %v884_v41 }
 0x1f3   : > { %1016 = vmatprep.mubr.f32.mxu0 %v1970_v37  ;;  %1064 = vmatprep.mubr.f32.mxu1 %v1970_v37 }
 0x1f6   : > { %1017 = vmatmul.mubr.f32.gmra.mxu0 %v877_v42  ;;  %1065 = vmatmul.mubr.f32.gmra.mxu1 %v885_v43 }
 0x1f7   : > { %1022 = vmatprep.mubr.f32.mxu0 %v1970_v37  ;;  %1070 = vmatprep.mubr.f32.mxu1 %v1970_v37 }
 0x1fa   : > { %1023 = vmatmul.mubr.f32.gmra.mxu0 %v878_v44  ;;  %1071 = vmatmul.mubr.f32.gmra.mxu1 %v886_v45 }
 0x1fb   : > { %1028 = vmatprep.mubr.f32.mxu0 %v1970_v37  ;;  %1076 = vmatprep.mubr.f32.mxu1 %v1970_v37 }
 0x1fe   : > { %1029 = vmatmul.mubr.f32.gmra.mxu0 %v879_v46  ;;  %1077 = vmatmul.mubr.f32.gmra.mxu1 %v887_v47 }
 0x1ff   : > { %1034 = vmatprep.mubr.f32.mxu0 %v1970_v37  ;;  %1082 = vmatprep.mubr.f32.mxu1 %v1970_v37 }
 0x202   : > { %1035 = vmatmul.mubr.f32.gmra.mxu0 %v880_v48  ;;  %1083 = vmatmul.mubr.f32.gmra.mxu1 %v888_v49 }
 0x203   : > { %1040 = vmatprep.mubr.f32.mxu0 %v1970_v37  ;;  %1088 = vmatprep.mubr.f32.mxu1 %v1970_v37 }
 0x206   : > { %1041 = vmatmul.mubr.f32.gmra.mxu0 %v881_v50  ;;  %1089 = vmatmul.mubr.f32.gmra.mxu1 %v889_v51 }
 0x2aa   : > { %v1000_v58 = vpop.f32.mrf.mxu0  ;;  %v1048_v59 = vpop.f32.mrf.mxu1 }
 0x2ab   : > { %v1001_v60 = vadd.f32 %v1000_v58, %v2379_v56  ;;  %v1049_v61 = vadd.f32 %v1048_v59, %v2379_v56 }
 0x2ac   : > { %v1002_v62 = vpop.f32.mrf.mxu0  ;;  %v1050_v63 = vpop.f32.mrf.mxu1 }
 0x2ad   : > { %1095 = vst [vmem:[%s2254_s24] sm:$0xff] %v1001_v60  ;;  %1111 = vst [vmem:[%s2254_s24 + $0x80] sm:$0xff] %v1049_v61  ;;  %v1003_v0 = vadd.f32 %v1002_v62, %v2381_v57  ;;  %v1051_v1 = vadd.f32 %v1050_v63, %v2381_v57 }
 0x2ae   : > { %v1006_v3 = vpop.f32.mrf.mxu0  ;;  %v1054_v4 = vpop.f32.mrf.mxu1 }
 0x2af   : > { %1096 = vst [vmem:[%s2254_s24 + $0x8] sm:$0xff] %v1003_v0  ;;  %1112 = vst [vmem:[%s2254_s24 + $0x88] sm:$0xff] %v1051_v1  ;;  %v1007_v5 = vadd.f32 %v1006_v3, %v2379_v56  ;;  %v1055_v6 = vadd.f32 %v1054_v4, %v2379_v56 }
 0x2b0   : > { %v1008_v7 = vpop.f32.mrf.mxu0  ;;  %v1056_v8 = vpop.f32.mrf.mxu1 }
 0x2b1   : > { %1097 = vst [vmem:[%s2254_s24 + $0x10] sm:$0xff] %v1007_v5  ;;  %1113 = vst [vmem:[%s2254_s24 + $0x90] sm:$0xff] %v1055_v6  ;;  %v1009_v9 = vadd.f32 %v1008_v7, %v2381_v57  ;;  %v1057_v10 = vadd.f32 %v1056_v8, %v2381_v57 }
 0x2b2   : > { %v1012_v11 = vpop.f32.mrf.mxu0  ;;  %v1060_v12 = vpop.f32.mrf.mxu1 }
 0x2b3   : > { %1098 = vst [vmem:[%s2254_s24 + $0x18] sm:$0xff] %v1009_v9  ;;  %1114 = vst [vmem:[%s2254_s24 + $0x98] sm:$0xff] %v1057_v10  ;;  %v1013_v13 = vadd.f32 %v1012_v11, %v2379_v56  ;;  %v1061_v14 = vadd.f32 %v1060_v12, %v2379_v56 }
 0x2b4   : > { %v1014_v15 = vpop.f32.mrf.mxu0  ;;  %v1062_v16 = vpop.f32.mrf.mxu1 }
 0x2b5   : > { %1099 = vst [vmem:[%s2254_s24 + $0x20] sm:$0xff] %v1013_v13  ;;  %1115 = vst [vmem:[%s2254_s24 + $0xa0] sm:$0xff] %v1061_v14  ;;  %v1015_v17 = vadd.f32 %v1014_v15, %v2381_v57  ;;  %v1063_v18 = vadd.f32 %v1062_v16, %v2381_v57 }
 0x2b6   : > { %v1018_v19 = vpop.f32.mrf.mxu0  ;;  %v1066_v20 = vpop.f32.mrf.mxu1 }
 0x2b7   : > { %1100 = vst [vmem:[%s2254_s24 + $0x28] sm:$0xff] %v1015_v17  ;;  %1116 = vst [vmem:[%s2254_s24 + $0xa8] sm:$0xff] %v1063_v18  ;;  %v1019_v21 = vadd.f32 %v1018_v19, %v2379_v56  ;;  %v1067_v22 = vadd.f32 %v1066_v20, %v2379_v56 }
 0x2b8   : > { %v1020_v23 = vpop.f32.mrf.mxu0  ;;  %v1068_v24 = vpop.f32.mrf.mxu1 }
 0x2b9   : > { %1101 = vst [vmem:[%s2254_s24 + $0x30] sm:$0xff] %v1019_v21  ;;  %1117 = vst [vmem:[%s2254_s24 + $0xb0] sm:$0xff] %v1067_v22  ;;  %v1021_v25 = vadd.f32 %v1020_v23, %v2381_v57  ;;  %v1069_v26 = vadd.f32 %v1068_v24, %v2381_v57 }
 0x2ba   : > { %v1024_v27 = vpop.f32.mrf.mxu0  ;;  %v1072_v28 = vpop.f32.mrf.mxu1 }
 0x2bb   : > { %1102 = vst [vmem:[%s2254_s24 + $0x38] sm:$0xff] %v1021_v25  ;;  %1118 = vst [vmem:[%s2254_s24 + $0xb8] sm:$0xff] %v1069_v26  ;;  %v1025_v29 = vadd.f32 %v1024_v27, %v2379_v56  ;;  %v1073_v30 = vadd.f32 %v1072_v28, %v2379_v56 }
 0x2bc   : > { %v1026_v31 = vpop.f32.mrf.mxu0  ;;  %v1074_v32 = vpop.f32.mrf.mxu1 }
 0x2bd   : > { %1103 = vst [vmem:[%s2254_s24 + $0x40] sm:$0xff] %v1025_v29  ;;  %1119 = vst [vmem:[%s2254_s24 + $0xc0] sm:$0xff] %v1073_v30  ;;  %v1027_v33 = vadd.f32 %v1026_v31, %v2381_v57  ;;  %v1075_v34 = vadd.f32 %v1074_v32, %v2381_v57 }
 0x2be   : > { %v1030_v35 = vpop.f32.mrf.mxu0  ;;  %v1078_v36 = vpop.f32.mrf.mxu1 }
 0x2bf   : > { %1104 = vst [vmem:[%s2254_s24 + $0x48] sm:$0xff] %v1027_v33  ;;  %1120 = vst [vmem:[%s2254_s24 + $0xc8] sm:$0xff] %v1075_v34  ;;  %v1031_v37 = vadd.f32 %v1030_v35, %v2379_v56  ;;  %v1079_v38 = vadd.f32 %v1078_v36, %v2379_v56 }
 0x2c0   : > { %v1032_v39 = vpop.f32.mrf.mxu0  ;;  %v1080_v40 = vpop.f32.mrf.mxu1 }
 0x2c1   : > { %1105 = vst [vmem:[%s2254_s24 + $0x50] sm:$0xff] %v1031_v37  ;;  %1121 = vst [vmem:[%s2254_s24 + $0xd0] sm:$0xff] %v1079_v38  ;;  %v1033_v41 = vadd.f32 %v1032_v39, %v2381_v57  ;;  %v1081_v42 = vadd.f32 %v1080_v40, %v2381_v57 }
 0x2c2   : > { %v1036_v43 = vpop.f32.mrf.mxu0  ;;  %v1084_v44 = vpop.f32.mrf.mxu1 }
 0x2c3   : > { %1106 = vst [vmem:[%s2254_s24 + $0x58] sm:$0xff] %v1033_v41  ;;  %1122 = vst [vmem:[%s2254_s24 + $0xd8] sm:$0xff] %v1081_v42  ;;  %v1037_v45 = vadd.f32 %v1036_v43, %v2379_v56  ;;  %v1085_v46 = vadd.f32 %v1084_v44, %v2379_v56 }
 0x2c4   : > { %v1038_v47 = vpop.f32.mrf.mxu0  ;;  %v1086_v48 = vpop.f32.mrf.mxu1 }
 0x2c5   : > { %1107 = vst [vmem:[%s2254_s24 + $0x60] sm:$0xff] %v1037_v45  ;;  %1123 = vst [vmem:[%s2254_s24 + $0xe0] sm:$0xff] %v1085_v46  ;;  %v1039_v49 = vadd.f32 %v1038_v47, %v2381_v57  ;;  %v1087_v50 = vadd.f32 %v1086_v48, %v2381_v57 }
 0x2c6   : > { %v1042_v51 = vpop.f32.mrf.mxu0  ;;  %v1090_v52 = vpop.f32.mrf.mxu1 }
 0x2c7   : > { %1108 = vst [vmem:[%s2254_s24 + $0x68] sm:$0xff] %v1039_v49  ;;  %1124 = vst [vmem:[%s2254_s24 + $0xe8] sm:$0xff] %v1087_v50  ;;  %v1043_v53 = vadd.f32 %v1042_v51, %v2379_v56  ;;  %v1091_v54 = vadd.f32 %v1090_v52, %v2379_v56 }
 0x2c8   : > { %v1044_v55 = vpop.f32.mrf.mxu0  ;;  %v1092_v2 = vpop.f32.mrf.mxu1 }
 0x2c9   : > { %1109 = vst [vmem:[%s2254_s24 + $0x70] sm:$0xff] %v1043_v53  ;;  %1125 = vst [vmem:[%s2254_s24 + $0xf0] sm:$0xff] %v1091_v54  ;;  %v1045_v58 = vadd.f32 %v1044_v55, %v2381_v57  ;;  %v1093_v59 = vadd.f32 %v1092_v2, %v2381_v57 }
 0x2cb   : > { %1110 = vst [vmem:[%s2254_s24 + $0x78] sm:$0xff] %v1045_v58  ;;  %1126 = vst [vmem:[%s2254_s24 + $0xf8] sm:$0xff] %v1093_v59 }
 0x2cc   : > { %1820 = shalt.err (!%p1817_p3)
}
 0x2cd   : > { %s1821_s11 = scalar_lea.hbm %s2447_s15, 4096  ;;  %s1825_s24 = scalar_lea.hbm %s2594_s9, 16384 }
 0x2ce   : > { %p1822_p2 = scmp.ne.s32.totalorder %s2447_s15, %s1821_s11  ;;  %p1826_p12 = scmp.lt.s32.totalorder %s2447_s15, %s2594_s9 }
 0x2cf   : > { %p1827_p11 = scmp.lt.s32.totalorder %s1825_s24, %s1821_s11 }
 0x2d0   : > { %p1823_p10 = pnand %p1822_p2, %p2595_p8 }
 0x2d1   : > { %p1828_p6 = por %p1827_p11, %p1826_p12 }
 0x2d2   : > { %p1824_p0 = pneg %p1823_p10 }
 0x2d4   : > { %p1829_p9 = pnand %p1828_p6, %p1824_p0 }
 0x2d6   : > { %1832 = shalt.err (!%p1829_p9)
}
 0x2d7   : > { %s1972_s3 = smov 256   ;;  %s1973_s0 = smov 512  }
 0x2d8   : > { %s1974_s29 = smov 16  }
 0x2d9   : > { %1517 = dma.vmem_to_hbm [thread:$0]  (%p2595_p8), %s2449_s1, 4096, %s2447_s15, %s2459_s12, %s1972_s3, %s1973_s0, %s1974_s29  }
 0x2da PF: > { %p1537_p13 = scmp.ge.s32.totalorder %s1959_s6, 2  ;;  %s1159_s30 = sand.u32 1, %s1907_s18  }
 0x2db   : > { %p2596_p4 = scmp.ne.s32.totalorder %s2578_s8, 0  ;;  %s1160_s7 = scalar_lea.sflag [#allocation5], %s1159_s30 }
 0x2dd   : > { %p1531_p7 = pnand %p1537_p13, %p2596_p4 }
 0x2df   : > { %p1532_p1 = pneg %p1531_p7 }
 0x2e1   : > { %1902 = dma.done.wait (%p1532_p1), %s1160_s7, 4096  }
 0x2e2   : > { %1904 = vsyncadd (%p1532_p1), %s1160_s7, 4294963200  ;;  %s22_s6 = sadd.s32 1, %s1959_s6   ;;  %s2598_s21 = sld [smem:[#allocation14_spill]] }
 0x2e3   : > { %p2487_p5 = scmp.ge.s32.totalorder %s22_s6, 6   ;;  %s2599_s20 = sld [smem:[#allocation24_spill]] }
 0x2e4   : > { %s2600_s5 = sld [smem:[#allocation15_spill]]  ;;  %s2608_s18 = smov %s1911_s19 }
 0x2e5   : > { %s2601_s23 = sld [smem:[#allocation25_spill]]  ;;  %s2612_s24 = smov %s1935_s25 }
 0x2e6   : > { %s2602_s1 = sld [smem:[#allocation16_spill]] }
 0x2e7   : > { %s2603_s26 = sld [smem:[#allocation23_spill]] }
 0x2e8   : > { %s2604_s27 = sld [smem:[#allocation19_spill]]  ;;  %s2609_s19 = smov %s2598_s21 }
 0x2e9   : > { %s2605_s28 = sld [smem:[#allocation20_spill]]  ;;  %s2610_s21 = smov %s1923_s22 }
 0x2ea   : > { %s2606_s29 = sld [smem:[#allocation21_spill]]  ;;  %s2611_s22 = smov %s2600_s5 }
 0x2eb   : > { %s2607_s30 = sld [smem:[#allocation22_spill]]  ;;  %21 = sbr.rel (!%p2487_p5) target bundleno = 18 (0x12), region = 107 }
 0x2ec   : > { %s2613_s25 = smov %s2602_s1 }
 0x2f0   :  { %1165 = vsyncpa [#allocation4], 1 }
 0x2f1   :  { %1167 = vsyncpa [#allocation4 + $0x1], 1 }
 0x2f2   :  { %1168 = vsyncpa [#allocation7], 1 }
 0x2f3   :  { %1169 = vsyncpa [#allocation5], 1 }
 0x2f4   :  { %1171 = vsyncpa [#allocation5 + $0x1], 1 }

</bundles_post_ra>
